<compile_context>
chip_gen: v5e
topology: v5e:2x2
jax: 0.10.0
libtpu: 0.0.40
codegen_flags: <defaults>
</compile_context>

<pallas_src>
import functools

import jax
import jax.numpy as jnp
import numpy as np
from jax.experimental import pallas as pl
from jax.experimental.pallas import tpu as pltpu

EPS = 1e-5


# --------------------------------------------------------------------------
# Helpers
# --------------------------------------------------------------------------
def _vmem_capacity_bytes():
    """Physical VMEM per TensorCore (v5e/v6e: 128 MiB, v7x: 64 MiB)."""
    try:
        return int(pltpu.get_tpu_info().vmem_capacity_bytes)
    except Exception:
        return 64 * 1024 * 1024  # conservative fallback (v7x-sized)


def _fold_bn(s, sq, gamma, beta, n):
    """Fold training-mode BatchNorm (biased var) + affine into scale/shift.

    s, sq, gamma, beta: (C, 1) float32.  Returns (scale, shift), each (C, 1).
    NOTE: single-pass E[x^2]-E[x]^2 in f32 with a >=0 clamp; adequate for
    activation-scale data (a Welford combine would be more robust for inputs
    with |mean| >> std).
    """
    mean = s / n
    var = jnp.maximum(sq / n - mean * mean, 0.0)
    inv = jax.lax.rsqrt(var + EPS)
    scale = gamma.astype(jnp.float32) * inv
    shift = beta.astype(jnp.float32) - mean * scale
    return scale, shift


# --------------------------------------------------------------------------
# Fused fast path: whole block in one un-gridded pallas_call (small problems)
# --------------------------------------------------------------------------
def _fused_kernel(*refs, has_shortcut):
    if has_shortcut:
        (x_ref, g0_ref, be0_ref, g1_ref, be1_ref,
         w0_ref, b0_ref, w1_ref, b1_ref, ws_ref,
         o_ref, net_scr) = refs
    else:
        (x_ref, g0_ref, be0_ref, g1_ref, be1_ref,
         w0_ref, b0_ref, w1_ref, b1_ref,
         o_ref, net_scr) = refs
        ws_ref = None

    B, c_in, T = x_ref.shape
    c_h = net_scr.shape[1]
    n = B * T
    f32 = jnp.float32

    # ---- phase A: batch statistics of x (for bn_0) -------------------------
    def stat_x(b, carry):
        s, sq = carry
        xb = x_ref[b].astype(f32)                         # (c_in, T)
        return (s + jnp.sum(xb, axis=1, keepdims=True),
                sq + jnp.sum(xb * xb, axis=1, keepdims=True))

    s0, sq0 = jax.lax.fori_loop(
        0, B, stat_x,
        (jnp.zeros((c_in, 1), f32), jnp.zeros((c_in, 1), f32)))
    sc0, sh0 = _fold_bn(s0, sq0, g0_ref[...], be0_ref[...], n)

    # ---- phase B: net = fc_0(relu(bn_0(x))), plus statistics of net --------
    w0 = w0_ref[...]                                      # (c_h, c_in), mm dtype
    b0 = b0_ref[...]                                      # (c_h, 1) f32

    def compute_net(b, carry):
        s, sq = carry
        xb = x_ref[b].astype(f32)
        h = jnp.maximum(xb * sc0 + sh0, 0.0)
        nb = jnp.dot(w0, h.astype(w0.dtype),
                     preferred_element_type=f32) + b0     # (c_h, T) f32
        net_scr[b] = nb
        return (s + jnp.sum(nb, axis=1, keepdims=True),
                sq + jnp.sum(nb * nb, axis=1, keepdims=True))

    s1, sq1 = jax.lax.fori_loop(
        0, B, compute_net,
        (jnp.zeros((c_h, 1), f32), jnp.zeros((c_h, 1), f32)))
    sc1, sh1 = _fold_bn(s1, sq1, g1_ref[...], be1_ref[...], n)

    # ---- phase C: out = shortcut(x) + fc_1(relu(bn_1(net))) ----------------
    w1 = w1_ref[...]
    b1 = b1_ref[...]
    ws = ws_ref[...] if has_shortcut else None

    def apply_out(b, carry):
        nb = net_scr[b]
        h1 = jnp.maximum(nb * sc1 + sh1, 0.0)
        dx = jnp.dot(w1, h1.astype(w1.dtype),
                     preferred_element_type=f32) + b1
        xb = x_ref[b].astype(f32)
        if has_shortcut:
            x_s = jnp.dot(ws, xb.astype(ws.dtype), preferred_element_type=f32)
        else:
            x_s = xb
        o_ref[b] = (x_s + dx).astype(o_ref.dtype)
        return carry

    jax.lax.fori_loop(0, B, apply_out, 0)


def _run_fused(x, g0, be0, g1, be1, w0_mm, b0_2d, w1_mm, b1_2d, ws_mm,
               vmem_limit):
    B, c_in, T = x.shape
    c_h = w0_mm.shape[0]
    c_out = w1_mm.shape[0]
    has_sc = ws_mm is not None
    args = [x, g0, be0, g1, be1, w0_mm, b0_2d, w1_mm, b1_2d]
    if has_sc:
        args.append(ws_mm)
    return pl.pallas_call(
        functools.partial(_fused_kernel, has_shortcut=has_sc),
        out_shape=jax.ShapeDtypeStruct((B, c_out, T), x.dtype),
        scratch_shapes=[pltpu.VMEM((B, c_h, T), jnp.float32)],
        compiler_params=pltpu.CompilerParams(vmem_limit_bytes=vmem_limit),
        cost_estimate=pl.CostEstimate(
            flops=int(2 * B * T * (c_h * c_in + c_out * c_h
                                   + (c_out * c_in if has_sc else 0))
                      + 12 * B * T * (c_in + c_h)),
            transcendentals=0,
            bytes_accessed=int(4 * B * T * (c_in + c_out))),
    )(*args)


# --------------------------------------------------------------------------
# General tiled path: three pipelined pallas_calls, native (B, C, T) layout
# --------------------------------------------------------------------------
def _stats_kernel(x_ref, s_ref, sq_ref):
    # x_ref: (c_in, tT)   (batch dim squeezed);  per-batch partial sums.
    @pl.when(pl.program_id(1) == 0)
    def _():
        s_ref[...] = jnp.zeros_like(s_ref)
        sq_ref[...] = jnp.zeros_like(sq_ref)

    x = x_ref[...].astype(jnp.float32)
    s_ref[...] += jnp.sum(x, axis=1, keepdims=True)
    sq_ref[...] += jnp.sum(x * x, axis=1, keepdims=True)


def _fc0_kernel(x_ref, sc0_ref, sh0_ref, w0_ref, b0_ref,
                net_ref, s_ref, sq_ref, *, valid_t, tile_t):
    t = pl.program_id(1)

    @pl.when(t == 0)
    def _():
        s_ref[...] = jnp.zeros_like(s_ref)
        sq_ref[...] = jnp.zeros_like(sq_ref)

    x = x_ref[...].astype(jnp.float32)                    # (c_in, tT)
    h = jnp.maximum(x * sc0_ref[...] + sh0_ref[...], 0.0)
    net = jnp.dot(w0_ref[...], h.astype(w0_ref.dtype),
                  preferred_element_type=jnp.float32) + b0_ref[...]
    net_ref[...] = net.astype(net_ref.dtype)

    if valid_t is not None:
        # Padded lanes would contribute (shift0 / b0 make them nonzero);
        # mask them out of the bn_1 statistics.
        col = t * tile_t + jax.lax.broadcasted_iota(jnp.int32, net.shape, 1)
        net = jnp.where(col < valid_t, net, 0.0)

    s_ref[...] += jnp.sum(net, axis=1, keepdims=True)
    sq_ref[...] += jnp.sum(net * net, axis=1, keepdims=True)


def _fc1_kernel(*refs, has_shortcut):
    if has_shortcut:
        (net_ref, x_ref, sc1_ref, sh1_ref, w1_ref, b1_ref, ws_ref,
         o_ref) = refs
    else:
        net_ref, x_ref, sc1_ref, sh1_ref, w1_ref, b1_ref, o_ref = refs
        ws_ref = None

    net = net_ref[...].astype(jnp.float32)                # (c_h, tT)
    h = jnp.maximum(net * sc1_ref[...] + sh1_ref[...], 0.0)
    dx = jnp.dot(w1_ref[...], h.astype(w1_ref.dtype),
                 preferred_element_type=jnp.float32) + b1_ref[...]
    x = x_ref[...].astype(jnp.float32)
    if has_shortcut:
        x_s = jnp.dot(ws_ref[...], x.astype(ws_ref.dtype),
                      preferred_element_type=jnp.float32)
    else:
        x_s = x
    o_ref[...] = (x_s + dx).astype(o_ref.dtype)


def _pick_tile_t(t_pad, c_sum, vmem_limit, max_tile_t):
    """Largest 128-multiple lane tile dividing t_pad under the VMEM budget."""
    budget = vmem_limit // 2              # double-buffered streamed operands
    max_tt = min(8192, budget // (8 * c_sum))
    if max_tile_t is not None:
        max_tt = min(max_tt, int(max_tile_t))
    max_tt = max(128, (max_tt // 128) * 128)
    max_tt = min(max_tt, t_pad)
    for cand in range(max_tt, 127, -128):
        if t_pad % cand == 0:
            return cand
    return 128


def _run_multi_pass(x, g0, be0, g1, be1, w0_mm, b0_2d, w1_mm, b1_2d, ws_mm,
                    vmem_limit, max_tile_t):
    B, c_in, T = x.shape
    c_h = w0_mm.shape[0]
    c_out = w1_mm.shape[0]
    has_sc = ws_mm is not None
    n = B * T

    # Pad T to a 128 multiple so lane tiles stay aligned; masked in pass 2.
    t_pad = -(-T // 128) * 128
    x_p = x if t_pad == T else jnp.pad(x, ((0, 0), (0, 0), (0, t_pad - T)))
    n_p = B * t_pad

    c_sum = c_in + c_h + c_out
    tile_t = _pick_tile_t(t_pad, c_sum, vmem_limit, max_tile_t)
    n_t = t_pad // tile_t
    grid = (B, n_t)
    net_dtype = w0_mm.dtype   # bf16 intermediate when bf16 matmuls requested

    # ---- pass 1: per-batch partial statistics of x (for bn_0) -------------
    s0p, sq0p = pl.pallas_call(
        _stats_kernel,
        out_shape=(jax.ShapeDtypeStruct((B, c_in, 1), jnp.float32),
                   jax.ShapeDtypeStruct((B, c_in, 1), jnp.float32)),
        grid=grid,
        in_specs=[pl.BlockSpec((None, c_in, tile_t), lambda b, t: (b, 0, t))],
        out_specs=(pl.BlockSpec((None, c_in, 1), lambda b, t: (b, 0, 0)),
                   pl.BlockSpec((None, c_in, 1), lambda b, t: (b, 0, 0))),
        compiler_params=pltpu.CompilerParams(
            dimension_semantics=("parallel", "arbitrary"),
            vmem_limit_bytes=vmem_limit),
        cost_estimate=pl.CostEstimate(
            flops=int(3 * c_in * n_p), transcendentals=0,
            bytes_accessed=int(4 * c_in * n_p + 8 * B * c_in)),
    )(x_p)
    sc0, sh0 = _fold_bn(jnp.sum(s0p, axis=0), jnp.sum(sq0p, axis=0),
                        g0, be0, n)

    # ---- pass 2: net = fc_0(relu(bn_0(x))), plus partial stats of net -----
    kernel2 = functools.partial(
        _fc0_kernel, valid_t=(T if t_pad != T else None), tile_t=tile_t)
    net_p, s1p, sq1p = pl.pallas_call(
        kernel2,
        out_shape=(jax.ShapeDtypeStruct((B, c_h, t_pad), net_dtype),
                   jax.ShapeDtypeStruct((B, c_h, 1), jnp.float32),
                   jax.ShapeDtypeStruct((B, c_h, 1), jnp.float32)),
        grid=grid,
        in_specs=[
            pl.BlockSpec((None, c_in, tile_t), lambda b, t: (b, 0, t)),
            pl.BlockSpec((c_in, 1), lambda b, t: (0, 0)),
            pl.BlockSpec((c_in, 1), lambda b, t: (0, 0)),
            pl.BlockSpec((c_h, c_in), lambda b, t: (0, 0)),
            pl.BlockSpec((c_h, 1), lambda b, t: (0, 0)),
        ],
        out_specs=(pl.BlockSpec((None, c_h, tile_t), lambda b, t: (b, 0, t)),
                   pl.BlockSpec((None, c_h, 1), lambda b, t: (b, 0, 0)),
                   pl.BlockSpec((None, c_h, 1), lambda b, t: (b, 0, 0))),
        compiler_params=pltpu.CompilerParams(
            dimension_semantics=("parallel", "arbitrary"),
            vmem_limit_bytes=vmem_limit),
        cost_estimate=pl.CostEstimate(
            flops=int(2 * c_h * c_in * n_p + 6 * c_h * n_p + 2 * c_in * n_p),
            transcendentals=0,
            bytes_accessed=int(4 * c_in * n_p
                               + jnp.dtype(net_dtype).itemsize * c_h * n_p
                               + 4 * (c_h * c_in + c_h + 2 * c_in)
                               + 8 * B * c_h)),
    )(x_p, sc0, sh0, w0_mm, b0_2d)
    sc1, sh1 = _fold_bn(jnp.sum(s1p, axis=0), jnp.sum(sq1p, axis=0),
                        g1, be1, n)

    # ---- pass 3: out = shortcut(x) + fc_1(relu(bn_1(net))) ----------------
    in_specs = [
        pl.BlockSpec((None, c_h, tile_t), lambda b, t: (b, 0, t)),   # net
        pl.BlockSpec((None, c_in, tile_t), lambda b, t: (b, 0, t)),  # x
        pl.BlockSpec((c_h, 1), lambda b, t: (0, 0)),                 # scale1
        pl.BlockSpec((c_h, 1), lambda b, t: (0, 0)),                 # shift1
        pl.BlockSpec((c_out, c_h), lambda b, t: (0, 0)),             # W1
        pl.BlockSpec((c_out, 1), lambda b, t: (0, 0)),               # b1
    ]
    args = [net_p, x_p, sc1, sh1, w1_mm, b1_2d]
    if has_sc:
        in_specs.append(pl.BlockSpec((c_out, c_in), lambda b, t: (0, 0)))
        args.append(ws_mm)
    out_p = pl.pallas_call(
        functools.partial(_fc1_kernel, has_shortcut=has_sc),
        out_shape=jax.ShapeDtypeStruct((B, c_out, t_pad), x.dtype),
        grid=grid,
        in_specs=in_specs,
        out_specs=pl.BlockSpec((None, c_out, tile_t), lambda b, t: (b, 0, t)),
        compiler_params=pltpu.CompilerParams(
            dimension_semantics=("parallel", "parallel"),
            vmem_limit_bytes=vmem_limit),
        cost_estimate=pl.CostEstimate(
            flops=int(2 * c_out * c_h * n_p + 4 * c_h * n_p + c_out * n_p
                      + (2 * c_out * c_in * n_p if has_sc else 0)),
            transcendentals=0,
            bytes_accessed=int(jnp.dtype(net_dtype).itemsize * c_h * n_p
                               + 4 * (c_in + c_out) * n_p
                               + 4 * (c_out * c_h + c_out + 2 * c_h)
                               + (4 * c_out * c_in if has_sc else 0))),
    )(*args)

    return out_p if t_pad == T else out_p[:, :, :T]


# --------------------------------------------------------------------------
# Public wrapper
# --------------------------------------------------------------------------
def resnet_block_conv1d(x, params, *, matmul_dtype=jnp.float32,
                        force_multi_pass=False, max_tile_t=None):
    """Forward pass of ResnetBlockConv1d (training-mode BatchNorm statistics).

    Args:
      x: (B, size_in, T) array.
      params: dict with bn0_gamma/bn0_beta (size_in,), bn1_gamma/bn1_beta
        (size_h,), w0 (size_h, size_in), b0 (size_h,), w1 (size_out, size_h),
        b1 (size_out,), optional ws (size_out, size_in) shortcut weight
        (required iff size_in != size_out).
      matmul_dtype: dtype for MXU operands (f32 default; bf16 halves weight /
        net traffic and uses the native bf16 MXU at a small accuracy cost).
      force_multi_pass: skip the fused-in-VMEM fast path (for testing).
      max_tile_t: optional cap on the lane tile of the tiled path (testing).
    Returns:
      (B, size_out, T) array, same dtype as x.
    """
    x = jnp.asarray(x)
    B, c_in, T = x.shape
    f32 = jnp.float32
    mm = jnp.dtype(matmul_dtype)

    w0 = jnp.asarray(params["w0"], f32)
    b0 = jnp.asarray(params["b0"], f32)
    w1 = jnp.asarray(params["w1"], f32)
    b1 = jnp.asarray(params["b1"], f32)
    ws = params.get("ws", None)
    c_h, c_out = w0.shape[0], w1.shape[0]
    if ws is None:
        assert c_in == c_out, "identity shortcut requires size_in == size_out"
        ws_mm = None
    else:
        ws_mm = jnp.asarray(ws, f32).astype(mm)

    w0_mm = w0.astype(mm)
    w1_mm = w1.astype(mm)
    b0_2d = b0.reshape(c_h, 1)
    b1_2d = b1.reshape(c_out, 1)
    g0 = jnp.asarray(params["bn0_gamma"], f32).reshape(c_in, 1)
    be0 = jnp.asarray(params["bn0_beta"], f32).reshape(c_in, 1)
    g1 = jnp.asarray(params["bn1_gamma"], f32).reshape(c_h, 1)
    be1 = jnp.asarray(params["bn1_beta"], f32).reshape(c_h, 1)

    vmem_cap = _vmem_capacity_bytes()                 # 64 MiB v7x, 128 MiB v5e/v6e
    vmem_limit = min(int(vmem_cap * 0.85), 100 * 1024 * 1024)

    # Fused fast path when x + net + out (plus weights) comfortably fit VMEM.
    fused_bytes = (4 * B * T * (c_in + c_h + c_out)
                   + 4 * (c_h * c_in + c_out * c_h + c_out * c_in))
    if (not force_multi_pass) and 3 * fused_bytes <= vmem_limit:
        return _run_fused(x, g0, be0, g1, be1, w0_mm, b0_2d, w1_mm, b1_2d,
                          ws_mm, vmem_limit)

    return _run_multi_pass(x, g0, be0, g1, be1, w0_mm, b0_2d, w1_mm, b1_2d,
                           ws_mm, vmem_limit, max_tile_t)


# --------------------------------------------------------------------------
# Pure-JAX reference mirroring the PyTorch forward (training-mode BN)
# --------------------------------------------------------------------------
def _reference(x, params):
    def bn(v, gamma, beta):
        mean = jnp.mean(v, axis=(0, 2), keepdims=True)
        var = jnp.mean((v - mean) ** 2, axis=(0, 2), keepdims=True)
        return (gamma[None, :, None] * (v - mean) / jnp.sqrt(var + EPS)
                + beta[None, :, None])

    def conv1x1(v, w, b=None):
        y = jnp.einsum("oc,bct->bot", w, v)
        return y if b is None else y + b[None, :, None]

    h = jax.nn.relu(bn(x, params["bn0_gamma"], params["bn0_beta"]))
    net = conv1x1(h, params["w0"], params["b0"])
    h1 = jax.nn.relu(bn(net, params["bn1_gamma"], params["bn1_beta"]))
    dx = conv1x1(h1, params["w1"], params["b1"])
    ws = params.get("ws", None)
    x_s = x if ws is None else conv1x1(x, ws)
    return x_s + dx


# --------------------------------------------------------------------------
if __name__ == "__main__":
    key = jax.random.PRNGKey(0)

    def make_params(k, c_in, c_h, c_out):
        ks = jax.random.split(k, 9)
        p = {
            "bn0_gamma": 1.0 + 0.05 * jax.random.normal(ks[0], (c_in,), jnp.float32),
            "bn0_beta": 0.05 * jax.random.normal(ks[1], (c_in,), jnp.float32),
            "bn1_gamma": 1.0 + 0.05 * jax.random.normal(ks[2], (c_h,), jnp.float32),
            "bn1_beta": 0.05 * jax.random.normal(ks[3], (c_h,), jnp.float32),
            "w0": 0.1 * jax.random.normal(ks[4], (c_h, c_in), jnp.float32),
            "b0": 0.05 * jax.random.normal(ks[5], (c_h,), jnp.float32),
            # The module zero-inits fc_1.weight; small random values are used
            # here so the second conv/matmul path is actually exercised.
            "w1": 0.1 * jax.random.normal(ks[6], (c_out, c_h), jnp.float32),
            "b1": 0.05 * jax.random.normal(ks[7], (c_out,), jnp.float32),
        }
        if c_in != c_out:
            p["ws"] = 0.1 * jax.random.normal(ks[8], (c_out, c_in), jnp.float32)
        return p

    k0, k1, k2, k3, k4, k5 = jax.random.split(key, 6)

    # 1) identity shortcut, fused fast path.
    xa = jax.random.normal(k0, (2, 32, 256), jnp.float32)
    pa = make_params(k1, 32, 64, 32)
    out = jax.block_until_ready(resnet_block_conv1d(xa, pa))
    np.testing.assert_allclose(np.asarray(out), np.asarray(_reference(xa, pa)),
                               rtol=1e-4, atol=1e-4)

    # 2) 1x1-conv shortcut, fused fast path, ragged T.
    xb = jax.random.normal(k2, (2, 24, 200), jnp.float32)
    pb = make_params(k3, 24, 32, 40)
    out = jax.block_until_ready(resnet_block_conv1d(xb, pb))
    np.testing.assert_allclose(np.asarray(out), np.asarray(_reference(xb, pb)),
                               rtol=1e-4, atol=1e-4)

    # 3) identity shortcut, tiled multi-pass path with multiple lane tiles
    #    (exercises the accumulate-over-t / pl.when init pattern).
    xc = jax.random.normal(k4, (2, 32, 512), jnp.float32)
    pc = make_params(k5, 32, 64, 32)
    out = jax.block_until_ready(
        resnet_block_conv1d(xc, pc, force_multi_pass=True, max_tile_t=128))
    np.testing.assert_allclose(np.asarray(out), np.asarray(_reference(xc, pc)),
                               rtol=1e-4, atol=1e-4)

    # 4) projection shortcut, tiled multi-pass path with ragged T
    #    (exercises padding + masked bn_1 statistics).
    out = jax.block_until_ready(
        resnet_block_conv1d(xb, pb, force_multi_pass=True))
    np.testing.assert_allclose(np.asarray(out), np.asarray(_reference(xb, pb)),
                               rtol=1e-4, atol=1e-4)

    # 5) bf16 MXU operands (looser tolerance; BN statistics stay f32).
    out = jax.block_until_ready(
        resnet_block_conv1d(xa, pa, matmul_dtype=jnp.bfloat16))
    np.testing.assert_allclose(np.asarray(out), np.asarray(_reference(xa, pa)),
                               rtol=5e-2, atol=5e-2)

    print("KERNEL_OK")
</pallas_src>

<mosaic_0001>
module attributes {stable_mosaic.version = 11 : i64} {
  func.func @_fused_kernel(%arg0: memref<2x32x256xf32, #tpu.memory_space<vmem>>, %arg1: memref<32x1xf32, #tpu.memory_space<vmem>>, %arg2: memref<32x1xf32, #tpu.memory_space<vmem>>, %arg3: memref<64x1xf32, #tpu.memory_space<vmem>>, %arg4: memref<64x1xf32, #tpu.memory_space<vmem>>, %arg5: memref<64x32xf32, #tpu.memory_space<vmem>>, %arg6: memref<64x1xf32, #tpu.memory_space<vmem>>, %arg7: memref<32x64xf32, #tpu.memory_space<vmem>>, %arg8: memref<32x1xf32, #tpu.memory_space<vmem>>, %arg9: memref<2x32x256xf32, #tpu.memory_space<vmem>>, %arg10: memref<2x64x256xf32, #tpu.memory_space<vmem>>) attributes {dimension_semantics = [], scalar_prefetch = 0 : i64, scratch_operands = 1 : i64, tpu.core_type = #tpu.core_type<tc>} {
    %cst = arith.constant 0.000000e+00 : f32
    %0 = vector.broadcast %cst : f32 to vector<32x1xf32>
    %cst_0 = arith.constant 0.000000e+00 : f32
    %1 = vector.broadcast %cst_0 : f32 to vector<32x1xf32>
    %c0_i32 = arith.constant 0 : i32
    %c2_i32 = arith.constant 2 : i32
    %2 = arith.addi %c0_i32, %c2_i32 : i32
    %c1_i32 = arith.constant 1 : i32
    %3:2 = scf.for %arg11 = %c0_i32 to %2 step %c1_i32 iter_args(%arg12 = %0, %arg13 = %1) -> (vector<32x1xf32>, vector<32x1xf32>)  : i32 {
      %45 = arith.index_cast %arg11 : i32 to index
      %c0_35 = arith.constant 0 : index
      %c0_36 = arith.constant 0 : index
      %46 = vector.load %arg0[%45, %c0_35, %c0_36] : memref<2x32x256xf32, #tpu.memory_space<vmem>>, vector<1x32x256xf32>
      %47 = vector.shape_cast %46 : vector<1x32x256xf32> to vector<32x256xf32>
      %cst_37 = arith.constant dense<0.000000e+00> : vector<32xf32>
      %48 = vector.multi_reduction <add>, %47, %cst_37 [1] : vector<32x256xf32> to vector<32xf32>
      %49 = vector.shape_cast %48 : vector<32xf32> to vector<32x1xf32>
      %50 = arith.addf %arg12, %49 : vector<32x1xf32>
      %51 = arith.mulf %47, %47 : vector<32x256xf32>
      %cst_38 = arith.constant dense<0.000000e+00> : vector<32xf32>
      %52 = vector.multi_reduction <add>, %51, %cst_38 [1] : vector<32x256xf32> to vector<32xf32>
      %53 = vector.shape_cast %52 : vector<32xf32> to vector<32x1xf32>
      %54 = arith.addf %arg13, %53 : vector<32x1xf32>
      scf.yield %50, %54 : vector<32x1xf32>, vector<32x1xf32>
    }
    %c2_i32_1 = arith.constant 2 : i32
    %c0 = arith.constant 0 : index
    %c0_2 = arith.constant 0 : index
    %4 = vector.load %arg1[%c0, %c0_2] : memref<32x1xf32, #tpu.memory_space<vmem>>, vector<32x1xf32>
    %c0_3 = arith.constant 0 : index
    %c0_4 = arith.constant 0 : index
    %5 = vector.load %arg2[%c0_3, %c0_4] : memref<32x1xf32, #tpu.memory_space<vmem>>, vector<32x1xf32>
    %cst_5 = arith.constant 5.120000e+02 : f32
    %6 = vector.broadcast %cst_5 : f32 to vector<32x1xf32>
    %7 = arith.divf %3#0, %6 : vector<32x1xf32>
    %cst_6 = arith.constant 5.120000e+02 : f32
    %8 = vector.broadcast %cst_6 : f32 to vector<32x1xf32>
    %9 = arith.divf %3#1, %8 : vector<32x1xf32>
    %10 = arith.mulf %7, %7 : vector<32x1xf32>
    %11 = arith.subf %9, %10 : vector<32x1xf32>
    %cst_7 = arith.constant 0.000000e+00 : f32
    %12 = vector.broadcast %cst_7 : f32 to vector<32x1xf32>
    %13 = arith.maximumf %11, %12 : vector<32x1xf32>
    %cst_8 = arith.constant 9.99999974E-6 : f32
    %14 = vector.broadcast %cst_8 : f32 to vector<32x1xf32>
    %15 = arith.addf %13, %14 : vector<32x1xf32>
    %16 = math.rsqrt %15 : vector<32x1xf32>
    %17 = arith.mulf %4, %16 : vector<32x1xf32>
    %18 = arith.mulf %7, %17 : vector<32x1xf32>
    %19 = arith.subf %5, %18 : vector<32x1xf32>
    %c0_9 = arith.constant 0 : index
    %c0_10 = arith.constant 0 : index
    %20 = vector.load %arg5[%c0_9, %c0_10] : memref<64x32xf32, #tpu.memory_space<vmem>>, vector<64x32xf32>
    %c0_11 = arith.constant 0 : index
    %c0_12 = arith.constant 0 : index
    %21 = vector.load %arg6[%c0_11, %c0_12] : memref<64x1xf32, #tpu.memory_space<vmem>>, vector<64x1xf32>
    %cst_13 = arith.constant 0.000000e+00 : f32
    %22 = vector.broadcast %cst_13 : f32 to vector<64x1xf32>
    %cst_14 = arith.constant 0.000000e+00 : f32
    %23 = vector.broadcast %cst_14 : f32 to vector<64x1xf32>
    %c0_i32_15 = arith.constant 0 : i32
    %c2_i32_16 = arith.constant 2 : i32
    %24 = arith.addi %c0_i32_15, %c2_i32_16 : i32
    %c1_i32_17 = arith.constant 1 : i32
    %25:2 = scf.for %arg11 = %c0_i32_15 to %24 step %c1_i32_17 iter_args(%arg12 = %22, %arg13 = %23) -> (vector<64x1xf32>, vector<64x1xf32>)  : i32 {
      %45 = arith.index_cast %arg11 : i32 to index
      %c0_35 = arith.constant 0 : index
      %c0_36 = arith.constant 0 : index
      %46 = vector.load %arg0[%45, %c0_35, %c0_36] : memref<2x32x256xf32, #tpu.memory_space<vmem>>, vector<1x32x256xf32>
      %47 = vector.shape_cast %46 : vector<1x32x256xf32> to vector<32x256xf32>
      %48 = vector.broadcast %17 : vector<32x1xf32> to vector<32x256xf32>
      %49 = arith.mulf %47, %48 : vector<32x256xf32>
      %50 = vector.broadcast %19 : vector<32x1xf32> to vector<32x256xf32>
      %51 = arith.addf %49, %50 : vector<32x256xf32>
      %cst_37 = arith.constant 0.000000e+00 : f32
      %52 = vector.broadcast %cst_37 : f32 to vector<32x256xf32>
      %53 = arith.maximumf %51, %52 : vector<32x256xf32>
      %cst_38 = arith.constant dense<0.000000e+00> : vector<64x256xf32>
      %54 = tpu.matmul %20, %53, %cst_38 {dimension_numbers = #tpu.dot_dimension_numbers<[1], [0], [0], [1], [0, 0, 1, 1], [], []>} : vector<64x32xf32>, vector<32x256xf32>, vector<64x256xf32> -> vector<64x256xf32>
      %55 = vector.broadcast %21 : vector<64x1xf32> to vector<64x256xf32>
      %56 = arith.addf %54, %55 : vector<64x256xf32>
      %57 = arith.index_cast %arg11 : i32 to index
      %c0_39 = arith.constant 0 : index
      %c0_40 = arith.constant 0 : index
      %58 = vector.load %arg10[%57, %c0_39, %c0_40] : memref<2x64x256xf32, #tpu.memory_space<vmem>>, vector<1x64x256xf32>
      %59 = vector.shape_cast %58 : vector<1x64x256xf32> to vector<64x256xf32>
      %60 = vector.shape_cast %56 : vector<64x256xf32> to vector<1x64x256xf32>
      tpu.vector_store %arg10[%57, %c0_39, %c0_40], %60 {strides = array<i32>} : memref<2x64x256xf32, #tpu.memory_space<vmem>>, vector<1x64x256xf32>,
      %cst_41 = arith.constant dense<0.000000e+00> : vector<64xf32>
      %61 = vector.multi_reduction <add>, %56, %cst_41 [1] : vector<64x256xf32> to vector<64xf32>
      %62 = vector.shape_cast %61 : vector<64xf32> to vector<64x1xf32>
      %63 = arith.addf %arg12, %62 : vector<64x1xf32>
      %64 = arith.mulf %56, %56 : vector<64x256xf32>
      %cst_42 = arith.constant dense<0.000000e+00> : vector<64xf32>
      %65 = vector.multi_reduction <add>, %64, %cst_42 [1] : vector<64x256xf32> to vector<64xf32>
      %66 = vector.shape_cast %65 : vector<64xf32> to vector<64x1xf32>
      %67 = arith.addf %arg13, %66 : vector<64x1xf32>
      scf.yield %63, %67 : vector<64x1xf32>, vector<64x1xf32>
    }
    %c2_i32_18 = arith.constant 2 : i32
    %c0_19 = arith.constant 0 : index
    %c0_20 = arith.constant 0 : index
    %26 = vector.load %arg3[%c0_19, %c0_20] : memref<64x1xf32, #tpu.memory_space<vmem>>, vector<64x1xf32>
    %c0_21 = arith.constant 0 : index
    %c0_22 = arith.constant 0 : index
    %27 = vector.load %arg4[%c0_21, %c0_22] : memref<64x1xf32, #tpu.memory_space<vmem>>, vector<64x1xf32>
    %cst_23 = arith.constant 5.120000e+02 : f32
    %28 = vector.broadcast %cst_23 : f32 to vector<64x1xf32>
    %29 = arith.divf %25#0, %28 : vector<64x1xf32>
    %cst_24 = arith.constant 5.120000e+02 : f32
    %30 = vector.broadcast %cst_24 : f32 to vector<64x1xf32>
    %31 = arith.divf %25#1, %30 : vector<64x1xf32>
    %32 = arith.mulf %29, %29 : vector<64x1xf32>
    %33 = arith.subf %31, %32 : vector<64x1xf32>
    %cst_25 = arith.constant 0.000000e+00 : f32
    %34 = vector.broadcast %cst_25 : f32 to vector<64x1xf32>
    %35 = arith.maximumf %33, %34 : vector<64x1xf32>
    %cst_26 = arith.constant 9.99999974E-6 : f32
    %36 = vector.broadcast %cst_26 : f32 to vector<64x1xf32>
    %37 = arith.addf %35, %36 : vector<64x1xf32>
    %38 = math.rsqrt %37 : vector<64x1xf32>
    %39 = arith.mulf %26, %38 : vector<64x1xf32>
    %40 = arith.mulf %29, %39 : vector<64x1xf32>
    %41 = arith.subf %27, %40 : vector<64x1xf32>
    %c0_27 = arith.constant 0 : index
    %c0_28 = arith.constant 0 : index
    %42 = vector.load %arg7[%c0_27, %c0_28] : memref<32x64xf32, #tpu.memory_space<vmem>>, vector<32x64xf32>
    %c0_29 = arith.constant 0 : index
    %c0_30 = arith.constant 0 : index
    %43 = vector.load %arg8[%c0_29, %c0_30] : memref<32x1xf32, #tpu.memory_space<vmem>>, vector<32x1xf32>
    %c0_i32_31 = arith.constant 0 : i32
    %c2_i32_32 = arith.constant 2 : i32
    %44 = arith.addi %c0_i32_31, %c2_i32_32 : i32
    %c1_i32_33 = arith.constant 1 : i32
    scf.for %arg11 = %c0_i32_31 to %44 step %c1_i32_33  : i32 {
      %45 = arith.index_cast %arg11 : i32 to index
      %c0_35 = arith.constant 0 : index
      %c0_36 = arith.constant 0 : index
      %46 = vector.load %arg10[%45, %c0_35, %c0_36] : memref<2x64x256xf32, #tpu.memory_space<vmem>>, vector<1x64x256xf32>
      %47 = vector.shape_cast %46 : vector<1x64x256xf32> to vector<64x256xf32>
      %48 = vector.broadcast %39 : vector<64x1xf32> to vector<64x256xf32>
      %49 = arith.mulf %47, %48 : vector<64x256xf32>
      %50 = vector.broadcast %41 : vector<64x1xf32> to vector<64x256xf32>
      %51 = arith.addf %49, %50 : vector<64x256xf32>
      %cst_37 = arith.constant 0.000000e+00 : f32
      %52 = vector.broadcast %cst_37 : f32 to vector<64x256xf32>
      %53 = arith.maximumf %51, %52 : vector<64x256xf32>
      %cst_38 = arith.constant dense<0.000000e+00> : vector<32x256xf32>
      %54 = tpu.matmul %42, %53, %cst_38 {dimension_numbers = #tpu.dot_dimension_numbers<[1], [0], [0], [1], [0, 0, 1, 1], [], []>} : vector<32x64xf32>, vector<64x256xf32>, vector<32x256xf32> -> vector<32x256xf32>
      %55 = vector.broadcast %43 : vector<32x1xf32> to vector<32x256xf32>
      %56 = arith.addf %54, %55 : vector<32x256xf32>
      %57 = arith.index_cast %arg11 : i32 to index
      %c0_39 = arith.constant 0 : index
      %c0_40 = arith.constant 0 : index
      %58 = vector.load %arg0[%57, %c0_39, %c0_40] : memref<2x32x256xf32, #tpu.memory_space<vmem>>, vector<1x32x256xf32>
      %59 = vector.shape_cast %58 : vector<1x32x256xf32> to vector<32x256xf32>
      %60 = arith.addf %59, %56 : vector<32x256xf32>
      %61 = arith.index_cast %arg11 : i32 to index
      %c0_41 = arith.constant 0 : index
      %c0_42 = arith.constant 0 : index
      %62 = vector.load %arg9[%61, %c0_41, %c0_42] : memref<2x32x256xf32, #tpu.memory_space<vmem>>, vector<1x32x256xf32>
      %63 = vector.shape_cast %62 : vector<1x32x256xf32> to vector<32x256xf32>
      %64 = vector.shape_cast %60 : vector<32x256xf32> to vector<1x32x256xf32>
      tpu.vector_store %arg9[%61, %c0_41, %c0_42], %64 {strides = array<i32>} : memref<2x32x256xf32, #tpu.memory_space<vmem>>, vector<1x32x256xf32>,
    }
    %c2_i32_34 = arith.constant 2 : i32
    return
  }
}

</mosaic_0001>

<bundles_post_ra>
// kernel: tpu_custom_call.1
= control target key start
LH: loop header
LB: loop body
LE: loop exit
PB: predicated region body
PF: predicated region fallthrough
CT: control target
= control target key end

     0   :  { %14 = vsyncpa [#allocation4], 0  ;;  %v1731_v0 = vmov 0.0   ;;  %v1733_v1 = vmov 0.0   ;;  %v1735_v2 = vmov 0.0   ;;  %v1737_v3 = vmov 0.0   ;;  %s2676_s0 = inlined_call_operand.vmem [shape: f32[2,32,256], index: 0, kind: input, shape index: {}]   ;;  %s2677_s1 = inlined_call_operand.vmem [shape: f32[32,1], index: 1, kind: input, shape index: {}]   ;;  %s2678_s2 = inlined_call_operand.vmem [shape: f32[32,1], index: 2, kind: input, shape index: {}]   ;;  %s2679_s3 = inlined_call_operand.vmem [shape: f32[64,1], index: 3, kind: input, shape index: {}]   ;;  %s2680_s4 = inlined_call_operand.vmem [shape: f32[64,1], index: 4, kind: input, shape index: {}]   ;;  %s2681_s5 = inlined_call_operand.vmem [shape: f32[64,32], index: 5, kind: input, shape index: {}]   ;;  %s2682_s6 = inlined_call_operand.vmem [shape: f32[64,1], index: 6, kind: input, shape index: {}]   ;;  %s2683_s7 = inlined_call_operand.vmem [shape: f32[32,64], index: 7, kind: input, shape index: {}]   ;;  %s2684_s8 = inlined_call_operand.vmem [shape: f32[32,1], index: 8, kind: input, shape index: {}]   ;;  %s2685_s9 = inlined_call_operand.hbm [shape: f32[2,32,256], index: 9, kind: output, shape index: {}]  }
   0x1   :  { %v1739_v4 = vmov 0.0   ;;  %v1741_v5 = vmov 0.0   ;;  %v1743_v6 = vmov 0.0   ;;  %v1745_v7 = vmov 0.0   ;;  %s1747_s30 = smov 0  }
   0x2 LB: > { %s1149_s10 = sshll.u32 %s1601_s30, 6  ;;  %s38_s30 = sadd.s32 1, %s1601_s30   ;;  %s1601_s30 = sphi %s1747_s30, %s38_s30   ;;  %v1597_v7 = vphi %v1745_v7, %v2696_v7   ;;  %v1593_v6 = vphi %v1743_v6, %v2695_v6   ;;  %v1589_v5 = vphi %v1741_v5, %v2694_v5   ;;  %v1585_v4 = vphi %v1739_v4, %v2693_v4   ;;  %v1581_v3 = vphi %v1737_v3, %v2692_v3   ;;  %v1577_v2 = vphi %v1735_v2, %v2691_v2   ;;  %v1573_v1 = vphi %v1733_v1, %v2690_v1   ;;  %v1569_v0 = vphi %v1731_v0, %v2689_v0  }
   0x3   : > { %s49_s13 = scalar_lea.vmem %s2676_s0, %s1149_s10  ;;  %p35_p0 = scmp.ge.s32.totalorder %s38_s30, 2  }
   0x4   : > { %v54_v8 = vld [vmem:[%s49_s13 + $0x20] sm:$0xff]  ;;  %v55_v9 = vld [vmem:[%s49_s13 + $0x28] sm:$0xff]  ;;  %v56_v16 = vld [vmem:[%s49_s13 + $0x30] sm:$0xff]  ;;  %v1675_v48 = vmov (%p35_p0), 512.0  }
   0x5   : > { %v50_v10 = vld [vmem:[%s49_s13] sm:$0xff]  ;;  %v64_v11 = vadd.f32 %v55_v9, %v54_v8  ;;  %v51_v12 = vld [vmem:[%s49_s13 + $0x8] sm:$0xff]  ;;  %v57_v17 = vld [vmem:[%s49_s13 + $0x38] sm:$0xff]  ;;  %v80_v26 = vmul.f32 %v56_v16, %v56_v16  ;;  %v78_v28 = vmul.f32 %v54_v8, %v54_v8  ;;  %v79_v29 = vmul.f32 %v55_v9, %v55_v9 }
   0x6   : > { %v74_v13 = vmul.f32 %v50_v10, %v50_v10  ;;  %v58_v14 = vadd.f32 %v51_v12, %v50_v10  ;;  %v75_v15 = vmul.f32 %v51_v12, %v51_v12  ;;  %v52_v19 = vld [vmem:[%s49_s13 + $0x10] sm:$0xff]  ;;  %v53_v20 = vld [vmem:[%s49_s13 + $0x18] sm:$0xff]  ;;  %v67_v23 = vadd.f32 %v57_v17, %v56_v16  ;;  %v1837_v12 = vld [vmem:[%s2681_s5 + $0x28] sm:$0xff] (%p35_p0) }
   0x7   : > { %65 = vadd.xlane.f32.xlu1 %v64_v11  ;;  %v76_v21 = vmul.f32 %v52_v19, %v52_v19  ;;  %v77_v22 = vmul.f32 %v53_v20, %v53_v20  ;;  %v61_v24 = vadd.f32 %v53_v20, %v52_v19  ;;  %v81_v27 = vmul.f32 %v57_v17, %v57_v17  ;;  %v1827_v10 = vld [vmem:[%s2681_s5 + $0x18] sm:$0xff] (%p35_p0)  ;;  %v1832_v11 = vld [vmem:[%s2681_s5 + $0x20] sm:$0xff] (%p35_p0)  ;;  %v1857_v20 = vld [vmem:[%s2682_s6 + $0x8] sm:$0xff] (%p35_p0) }
   0x8   : > { %59 = vadd.xlane.f32.xlu0 %v58_v14  ;;  %v82_v18 = vadd.f32 %v75_v15, %v74_v13  ;;  %v88_v31 = vadd.f32 %v79_v29, %v78_v28  ;;  %1401 = vrcp.f32 (%p35_p0), %v1675_v48  ;;  %v1842_v13 = vld [vmem:[%s2681_s5 + $0x30] sm:$0xff] (%p35_p0)  ;;  %v1847_v14 = vld [vmem:[%s2681_s5 + $0x38] sm:$0xff] (%p35_p0)  ;;  %v1852_v15 = vld [vmem:[%s2682_s6] sm:$0xff] (%p35_p0) }
   0x9   : > { %v85_v25 = vadd.f32 %v77_v22, %v76_v21  ;;  %v91_v30 = vadd.f32 %v81_v27, %v80_v26  ;;  %2698 = vst [vmem:[#allocation7_spill] sm:$0xff] (%p35_p0), %v1852_v15  ;;  %v1862_v21 = vld [vmem:[%s2682_s6 + $0x10] sm:$0xff] (%p35_p0)  ;;  %v1867_v22 = vld [vmem:[%s2682_s6 + $0x18] sm:$0xff] (%p35_p0) }
   0xa   : > { %83 = vadd.xlane.f32.xlu2 %v82_v18  ;;  %v1882_v29 = vld [vmem:[%s2682_s6 + $0x30] sm:$0xff] (%p35_p0) }
   0xe   :  { %v1402_v49 = vpop.eup (%p35_p0), %1401 }
   0xf   : > { %68 = vadd.xlane.f32.xlu1 %v67_v23  ;;  %v107_v50 = vmul.f32 (%p35_p0), 512.0, %v1402_v49  ;;  %vm111_vm0 = vweird.f32 (%p35_p0), %v1402_v49  ;;  %v1872_v23 = vld [vmem:[%s2682_s6 + $0x20] sm:$0xff] (%p35_p0) }
  0x10   : > { %62 = vadd.xlane.f32.xlu0 %v61_v24  ;;  %v1877_v24 = vld [vmem:[%s2682_s6 + $0x28] sm:$0xff] (%p35_p0) }
  0x11   :  { %v108_v51 = vsub.f32 (%p35_p0), 1.0, %v107_v50  ;;  %v98_v50 = vld [vmem:[%s2677_s1] sm:$0xff] (%p35_p0) }
  0x12   : > { %86 = vadd.xlane.f32.xlu2 %v85_v25 }
  0x13   :  { %v109_v52 = vmul.f32 (%p35_p0), %v1402_v49, %v108_v51 }
  0x15   :  { %v110_v53 = vadd.f32 (%p35_p0), %v1402_v49, %v109_v52 }
  0x17   : > { %92 = vadd.xlane.f32.xlu1 %v91_v30  ;;  %v1783_v54 = vsel (%p35_p0), %vm111_vm0, %v1402_v49, %v110_v53  ;;  %v1887_v30 = vld [vmem:[%s2682_s6 + $0x38] sm:$0xff] (%p35_p0) }
  0x18   : > { %89 = vadd.xlane.f32.xlu0 %v88_v31 }
  0x7a   : > { %v66_v32 = vpop.xlane.xlu1 %65 }
  0x7b   : > { %v72_v33 = vadd.f32 %v1589_v5, %v66_v32   ;;  %v60_v34 = vpop.xlane.xlu0 %59 }
  0x7c   : > { %v70_v35 = vadd.f32 %v1597_v7, %v60_v34  }
  0x7d   : > { %v84_v36 = vpop.xlane.xlu2 %83  ;;  %v2694_v5 = vmov %v72_v33  ;;  %v1792_v57 = vmul.f32 (%p35_p0), %v1783_v54, %v72_v33 }
  0x7e   : > { %v94_v37 = vadd.f32 %v1581_v3, %v84_v36   ;;  %v2696_v7 = vmov %v70_v35  ;;  %v1786_v55 = vmul.f32 (%p35_p0), %v1783_v54, %v70_v35  ;;  %v1822_v5 = vld [vmem:[%s2681_s5 + $0x10] sm:$0xff] (%p35_p0) }
  0x80   : > { %v2692_v3 = vmov %v94_v37  ;;  %v117_v59 = vmul.f32 (%p35_p0), %v1783_v54, %v94_v37  ;;  %v121_v63 = vmul.f32 (%p35_p0), %v1786_v55, %v1786_v55 }
  0x81   :  { %v1812_v3 = vld [vmem:[%s2681_s5] sm:$0xff] (%p35_p0) }
  0x82   : > { %v69_v38 = vpop.xlane.xlu1 %68  ;;  %2697 = vst [vmem:[#allocation6_spill] sm:$0xff] (%p35_p0), %v1812_v3 }
  0x83   : > { %v73_v39 = vadd.f32 %v1585_v4, %v69_v38   ;;  %v63_v40 = vpop.xlane.xlu0 %62 }
  0x84   : > { %v71_v41 = vadd.f32 %v1593_v6, %v63_v40  }
  0x85   : > { %v87_v42 = vpop.xlane.xlu2 %86  ;;  %v2693_v4 = vmov %v73_v39  ;;  %v1795_v58 = vmul.f32 (%p35_p0), %v1783_v54, %v73_v39 }
  0x86   : > { %v95_v43 = vadd.f32 %v1577_v2, %v87_v42   ;;  %v2695_v6 = vmov %v71_v41  ;;  %v1789_v56 = vmul.f32 (%p35_p0), %v1783_v54, %v71_v41  ;;  %v1817_v4 = vld [vmem:[%s2681_s5 + $0x8] sm:$0xff] (%p35_p0) }
  0x87   :  { %v125_v6 = vsub.f32 (%p35_p0), %v117_v59, %v121_v63  ;;  %v99_v59 = vld [vmem:[%s2677_s1 + $0x8] sm:$0xff] (%p35_p0) }
  0x88   : > { %v2691_v2 = vmov %v95_v43  ;;  %v118_v60 = vmul.f32 (%p35_p0), %v1783_v54, %v95_v43 }
  0x89   :  { %v124_v2 = vmul.f32 (%p35_p0), %v1795_v58, %v1795_v58  ;;  %v129_v16 = vmax.f32 (%p35_p0), %v125_v6, 0.0 }
  0x8a   : > { %v93_v44 = vpop.xlane.xlu1 %92  ;;  %37 = sbr.rel (!%p35_p0) target bundleno = 2 (0x2), region = 83 }
  0x8b   : > { %v97_v45 = vadd.f32 %v1569_v0, %v93_v44   ;;  %v90_v46 = vpop.xlane.xlu0 %89  ;;  %v133_v25 = vadd.f32 (%p35_p0), 1e-05, %v129_v16 }
  0x8c   : > { %v96_v47 = vadd.f32 %v1573_v1, %v90_v46  }
  0x8d   : > { %v2689_v0 = vmov %v97_v45  ;;  %v120_v62 = vmul.f32 (%p35_p0), %v1783_v54, %v97_v45  ;;  %1403 = vrsqrt.f32 (%p35_p0), %v133_v25  ;;  %vm143_vm1 = vweird.f32 (%p35_p0), %v133_v25 }
  0x8e   : > { %v2690_v1 = vmov %v96_v47  ;;  %v119_v61 = vmul.f32 (%p35_p0), %v1783_v54, %v96_v47  ;;  %v122_v0 = vmul.f32 (%p35_p0), %v1789_v56, %v1789_v56  ;;  %v1991_v47 = vmov (%p35_p0), 0.0  }
  0x8f   :  { %v123_v1 = vmul.f32 %v1792_v57, %v1792_v57  ;;  %v128_v9 = vsub.f32 %v120_v62, %v124_v2  ;;  %v100_v62 = vld [vmem:[%s2677_s1 + $0x10] sm:$0xff] }
  0x90   :  { %v126_v7 = vsub.f32 %v118_v60, %v122_v0 }
  0x91   :  { %v127_v8 = vsub.f32 %v119_v61, %v123_v1  ;;  %v132_v19 = vmax.f32 %v128_v9, 0.0  ;;  %v101_v1 = vld [vmem:[%s2677_s1 + $0x18] sm:$0xff] }
  0x92   :  { %v130_v17 = vmax.f32 %v126_v7, 0.0 }
  0x93   :  { %v131_v18 = vmax.f32 %v127_v8, 0.0  ;;  %v136_v28 = vadd.f32 1e-05, %v132_v19  ;;  %v1404_v31 = vpop.eup %1403  ;;  %v1918_v8 = vld [vmem:[%s2678_s2] sm:$0xff] }
  0x94   :  { %v134_v26 = vadd.f32 1e-05, %v130_v17  ;;  %v138_v33 = vmul.f32 %v1404_v31, %v133_v25  ;;  %vm144_vm2 = vweird.f32 %v1404_v31  ;;  %2704 = vst [vmem:[#allocation9_spill] sm:$0xff] %v1918_v8  ;;  %v1925_v17 = vld [vmem:[%s2678_s2 + $0x8] sm:$0xff] }
  0x95   :  { %v135_v27 = vadd.f32 1e-05, %v131_v18  ;;  %vm1889_vm7 = vmor %vm143_vm1, %vm144_vm2  ;;  %vm173_vm8 = vweird.f32 %v136_v28 }
  0x96   :  { %1405 = vrsqrt.f32 %v134_v26  ;;  %v139_v37 = vmul.f32 %v1404_v31, %v138_v33  ;;  %vm153_vm3 = vweird.f32 %v134_v26 }
  0x97   :  { %1407 = vrsqrt.f32 %v135_v27  ;;  %vm163_vm5 = vweird.f32 %v135_v27 }
  0x98   :  { %1409 = vrsqrt.f32 %v136_v28  ;;  %v140_v41 = vmul.f32 0.5, %v139_v37  ;;  %v1969_v37 = vmov 0.0  }
  0x9a   :  { %v141_v45 = vsub.f32 1.5, %v140_v41  ;;  %v1979_v41 = vmov 0.0  }
  0x9c   :  { %v1406_v32 = vpop.eup %1405  ;;  %v142_v51 = vmul.f32 %v1404_v31, %v141_v45  ;;  %v1987_v45 = vmov 0.0  }
  0x9d   :  { %v1408_v34 = vpop.eup %1407  ;;  %v148_v35 = vmul.f32 %v1406_v32, %v134_v26  ;;  %vm154_vm4 = vweird.f32 %v1406_v32  ;;  %v1936_v26 = vld [vmem:[%s2678_s2 + $0x10] sm:$0xff] }
  0x9e   :  { %v1410_v36 = vpop.eup %1409  ;;  %v158_v38 = vmul.f32 %v1408_v34, %v135_v27  ;;  %vm164_vm6 = vweird.f32 %v1408_v34  ;;  %vm1896_vm10 = vmor %vm153_vm3, %vm154_vm4  ;;  %v146_v63 = vsel %vm1889_vm7, %v1404_v31, %v142_v51  ;;  %v1947_v31 = vld [vmem:[%s2678_s2 + $0x18] sm:$0xff]  ;;  %s1997_s2 = smov 0  }
  0x9f   :  { %v149_v39 = vmul.f32 %v1406_v32, %v148_v35  ;;  %v168_v40 = vmul.f32 %v1410_v36, %v136_v28  ;;  %vm174_vm9 = vweird.f32 %v1410_v36  ;;  %vm165_vm11 = vmor %vm163_vm5, %vm164_vm6  ;;  %v1913_v7 = vmul.f32 %v146_v63, %v98_v50 }
  0xa0   :  { %v159_v42 = vmul.f32 %v1408_v34, %v158_v38  ;;  %vm175_vm12 = vmor %vm173_vm8, %vm174_vm9  ;;  %v1971_v38 = vmov 0.0  }
  0xa1   :  { %v150_v43 = vmul.f32 0.5, %v149_v39  ;;  %v169_v44 = vmul.f32 %v1410_v36, %v168_v40  ;;  %2703 = vst [vmem:[#allocation8_spill] sm:$0xff] %v1913_v7  ;;  %v1931_v25 = vmul.f32 %v1913_v7, %v1786_v55  ;;  %v1973_v39 = vmov 0.0  }
  0xa2   :  { %v160_v46 = vmul.f32 0.5, %v159_v42  ;;  %v1977_v40 = vmov 0.0   ;;  %v1981_v42 = vmov 0.0  }
  0xa3   :  { %v151_v48 = vsub.f32 1.5, %v150_v43  ;;  %v170_v49 = vmul.f32 0.5, %v169_v44  ;;  %v1983_v43 = vmov 0.0   ;;  %v1985_v44 = vmov 0.0  }
  0xa4   :  { %v161_v53 = vsub.f32 1.5, %v160_v46  ;;  %v1989_v46 = vmov 0.0  }
  0xa5   :  { %v152_v60 = vmul.f32 %v1406_v32, %v151_v48  ;;  %v171_v61 = vsub.f32 1.5, %v170_v49  ;;  %v1993_v48 = vmov 0.0   ;;  %v1995_v49 = vmov 0.0  }
  0xa6   :  { %v162_v0 = vmul.f32 %v1408_v34, %v161_v53 }
  0xa7   :  { %v156_v2 = vsel %vm1896_vm10, %v1406_v32, %v152_v60  ;;  %v172_v6 = vmul.f32 %v1410_v36, %v171_v61 }
  0xa8   :  { %v166_v9 = vsel %vm165_vm11, %v1408_v34, %v162_v0  ;;  %v1920_v16 = vmul.f32 %v156_v2, %v99_v59 }
  0xa9   :  { %v176_v18 = vsel %vm175_vm12, %v1410_v36, %v172_v6  ;;  %v1927_v19 = vmul.f32 %v166_v9, %v100_v62  ;;  %v1965_v36 = vmov 0.0  }
  0xaa   :  { %v1938_v27 = vmul.f32 %v176_v18, %v101_v1  ;;  %v1942_v28 = vmul.f32 %v1920_v16, %v1789_v56 }
  0xab   :  { %v1951_v55 = vmul.f32 %v1927_v19, %v1792_v57  ;;  %v1967_v57 = vmov 0.0  }
  0xac   :  { %v1957_v33 = vmul.f32 %v1938_v27, %v1795_v58  ;;  %v1975_v58 = vmov 0.0  }
  0xad LB: > { %v2705_v3 = vld [vmem:[#allocation6_spill] sm:$0xff]  ;;  %v1676_v50 = vmov 0   ;;  %v2706_v34 = vsub.f32 %v1936_v26, %v1951_v55  ;;  %v2708_v7 = vld [vmem:[#allocation8_spill] sm:$0xff]  ;;  %v2709_v15 = vld [vmem:[#allocation7_spill] sm:$0xff]  ;;  %v2712_v56 = vsub.f32 %v1925_v17, %v1942_v28  ;;  %s1150_s16 = sshll.u32 %s1669_s2, 6  ;;  %vm342_vm13 = vcmask 261120   ;;  %v1605_v36 = vphi %v1965_v36, %v2714_v36   ;;  %s1669_s2 = sphi %s1997_s2, %s210_s2   ;;  %v1665_v49 = vphi %v1995_v49, %v2729_v49   ;;  %v1661_v48 = vphi %v1993_v48, %v2728_v48   ;;  %v1657_v47 = vphi %v1991_v47, %v2727_v47   ;;  %v1653_v46 = vphi %v1989_v46, %v2726_v46   ;;  %v1649_v45 = vphi %v1987_v45, %v2725_v45   ;;  %v1645_v44 = vphi %v1985_v44, %v2724_v44   ;;  %v1641_v43 = vphi %v1983_v43, %v2723_v43   ;;  %v1637_v42 = vphi %v1981_v42, %v2722_v42   ;;  %v1633_v41 = vphi %v1979_v41, %v2721_v41   ;;  %v1629_v40 = vphi %v1977_v40, %v2720_v40   ;;  %v1625_v58 = vphi %v1975_v58, %v2719_v58   ;;  %v1621_v39 = vphi %v1973_v39, %v2718_v39   ;;  %v1617_v38 = vphi %v1971_v38, %v2717_v38   ;;  %v1613_v37 = vphi %v1969_v37, %v2716_v37   ;;  %v1609_v57 = vphi %v1967_v57, %v2715_v57  }
  0xae   : > { %1413 = vset.pattern.permute.xlu2 %v1676_v50  ;;  %1412 = vset.pattern.permute.xlu1 %v1676_v50  ;;  %v2707_v35 = vsub.f32 %v1947_v31, %v1957_v33  ;;  %v2710_v8 = vld [vmem:[#allocation9_spill] sm:$0xff]  ;;  %s229_s19 = scalar_lea.vmem %s2676_s0, %s1150_s16  ;;  %s1151_s20 = sshll.u32 %s1669_s2, 7 }
  0xaf   : > { %1411 = vset.pattern.permute.xlu0 %v1676_v50  ;;  %278 = vperm.xlu2 %1413, %v2706_v34   ;;  %v2711_v32 = vsub.f32 %v2710_v8, %v1931_v25  ;;  %v236_v51 = vld [vmem:[%s229_s19 + $0x30] sm:$0xff]  ;;  %v237_v52 = vld [vmem:[%s229_s19 + $0x38] sm:$0xff]  ;;  %v234_v6 = vld [vmem:[%s229_s19 + $0x20] sm:$0xff]  ;;  %s2111_s21 = scalar_lea.vmem [#allocation2], %s1151_s20  ;;  %s210_s2 = sadd.s32 1, %s1669_s2  }
  0xb0   : > { %283 = vperm.xlu1 %1412, %v2707_v35   ;;  %255 = vperm.xlu0 %1411, %v1938_v27   ;;  %v235_v9 = vld [vmem:[%s229_s19 + $0x28] sm:$0xff]  ;;  %p2146_p1 = scmp.ge.s32.totalorder %s210_s2, 2  }
  0xb1   :  { %s2578_s16 = smov (%p2146_p1), 0  }
  0xb7   : > { %240 = vperm.xlu2 %1413, %v2708_v7   ;;  %v230_v7 = vld [vmem:[%s229_s19] sm:$0xff] }
  0xb8   : > { %245 = vperm.xlu1 %1412, %v1920_v16   ;;  %250 = vperm.xlu0 %1411, %v1927_v19  }
  0xbf   : > { %304 = vperm.xlu2 %1413, %v2709_v15  }
  0xc0   : > { %268 = vperm.xlu1 %1412, %v2711_v32   ;;  %273 = vperm.xlu0 %1411, %v2712_v56  }
  0xc7   : > { %319 = vperm.xlu2 %1413, %v1867_v22  }
  0xc8   : > { %314 = vperm.xlu1 %1412, %v1862_v21   ;;  %309 = vperm.xlu0 %1411, %v1857_v20  }
  0xcf   : > { %334 = vperm.xlu2 %1413, %v1882_v29  }
  0xd0   : > { %329 = vperm.xlu1 %1412, %v1877_v24   ;;  %324 = vperm.xlu0 %1411, %v1872_v23  }
  0xd8   : > { %339 = vperm.xlu0 %1411, %v1887_v30  }
 0x109   : > { %v279_v0 = vpop.permute.xlu2 %278 }
 0x122   : > { %v284_v53 = vpop.permute.xlu1 %283  ;;  %v256_v59 = vpop.permute.xlu0 %255 }
 0x123   : > { %v264_v60 = vmul.f32 %v256_v59, %v236_v51  ;;  %v265_v61 = vmul.f32 %v256_v59, %v237_v52  ;;  %v232_v51 = vld [vmem:[%s229_s19 + $0x10] sm:$0xff]  ;;  %v233_v52 = vld [vmem:[%s229_s19 + $0x18] sm:$0xff]  ;;  %v231_v59 = vld [vmem:[%s229_s19 + $0x8] sm:$0xff] }
 0x125   : > { %v292_v62 = vadd.f32 %v284_v53, %v264_v60  ;;  %v293_v63 = vadd.f32 %v284_v53, %v265_v61  ;;  %v241_v61 = vpop.permute.xlu2 %240 }
 0x127   : > { %v300_v1 = vmax.f32 %v292_v62, 0.0  ;;  %v301_v2 = vmax.f32 %v293_v63, 0.0  ;;  %v258_v62 = vmul.f32 %v241_v61, %v230_v7 }
 0x129   : > { %379 = vmatpush.msra.mxu0 %v300_v1  ;;  %1155 = vmatpush.msra.mxu2 %v300_v1  ;;  %v259_v1 = vmul.f32 %v241_v61, %v231_v59 }
 0x12a   : > { %420 = vmatpush.msra.mxu1 %v301_v2  ;;  %1159 = vmatpush.msra.mxu3 %v301_v2  ;;  %v246_v18 = vpop.permute.xlu1 %245  ;;  %v251_v50 = vpop.permute.xlu0 %250 }
 0x12b   : > { %v262_v32 = vmul.f32 %v251_v50, %v234_v6  ;;  %v263_v34 = vmul.f32 %v251_v50, %v235_v9  ;;  %v260_v63 = vmul.f32 %v246_v18, %v232_v51  ;;  %v261_v8 = vmul.f32 %v246_v18, %v233_v52 }
 0x12d   : > { %v290_v35 = vadd.f32 %v279_v0, %v262_v32  ;;  %v291_v56 = vadd.f32 %v279_v0, %v263_v34 }
 0x12f   : > { %v298_v53 = vmax.f32 %v290_v35, 0.0  ;;  %v299_v60 = vmax.f32 %v291_v56, 0.0 }
 0x131   : > { %380 = vmatpush.msra.mxu0 %v298_v53  ;;  %1156 = vmatpush.msra.mxu2 %v298_v53 }
 0x132   : > { %421 = vmatpush.msra.mxu1 %v299_v60  ;;  %1160 = vmatpush.msra.mxu3 %v299_v60  ;;  %v269_v2 = vpop.permute.xlu1 %268  ;;  %v274_v6 = vpop.permute.xlu0 %273 }
 0x133   : > { %v286_v9 = vadd.f32 %v269_v2, %v258_v62  ;;  %v288_v32 = vadd.f32 %v274_v6, %v260_v63  ;;  %v289_v34 = vadd.f32 %v274_v6, %v261_v8  ;;  %v287_v0 = vadd.f32 %v269_v2, %v259_v1  ;;  %v305_v8 = vpop.permute.xlu2 %304 }
 0x135   : > { %v296_v50 = vmax.f32 %v288_v32, 0.0  ;;  %v297_v15 = vmax.f32 %v289_v34, 0.0  ;;  %v294_v56 = vmax.f32 %v286_v9, 0.0  ;;  %v295_v7 = vmax.f32 %v287_v0, 0.0 }
 0x137   : > { %381 = vmatpush.msra.mxu0 %v296_v50  ;;  %1157 = vmatpush.msra.mxu2 %v296_v50 }
 0x138   : > { %422 = vmatpush.msra.mxu1 %v297_v15  ;;  %1161 = vmatpush.msra.mxu3 %v297_v15 }
 0x139   : > { %382 = vmatpush.msra.mxu0 %v294_v56  ;;  %1158 = vmatpush.msra.mxu2 %v294_v56 }
 0x13a   : > { %423 = vmatpush.msra.mxu1 %v295_v7  ;;  %1162 = vmatpush.msra.mxu3 %v295_v7  ;;  %v310_v15 = vpop.permute.xlu0 %309  ;;  %v315_v53 = vpop.permute.xlu1 %314 }
 0x13b   : > { %1118 = vmatmul.msk.f32.vlgmr.msra.gmra.mxu0 %vm342_vm13, %v2705_v3  ;;  %1122 = vmatmul.msk.f32.vlgmr.msra.gmra.mxu2 %vm342_vm13, %v1832_v11 }
 0x13c   : > { %1126 = vmatmul.msk.f32.vlgmr.msra.gmra.mxu1 %vm342_vm13, %v2705_v3  ;;  %1130 = vmatmul.msk.f32.vlgmr.msra.gmra.mxu3 %vm342_vm13, %v1832_v11 }
 0x142   : > { %v325_v62 = vpop.permute.xlu0 %324 }
 0x143   : > { %1119 = vmatmul.msk.f32.gmra.mxu0 %vm342_vm13, %v1817_v4  ;;  %1123 = vmatmul.msk.f32.gmra.mxu2 %vm342_vm13, %v1837_v12 }
 0x144   : > { %1127 = vmatmul.msk.f32.gmra.mxu1 %vm342_vm13, %v1817_v4  ;;  %1131 = vmatmul.msk.f32.gmra.mxu3 %vm342_vm13, %v1837_v12 }
 0x14b   : > { %1120 = vmatmul.msk.f32.gmra.mxu0 %vm342_vm13, %v1822_v5  ;;  %1124 = vmatmul.msk.f32.gmra.mxu2 %vm342_vm13, %v1842_v13 }
 0x14c   : > { %1128 = vmatmul.msk.f32.gmra.mxu1 %vm342_vm13, %v1822_v5  ;;  %1132 = vmatmul.msk.f32.gmra.mxu3 %vm342_vm13, %v1842_v13 }
 0x153   : > { %1121 = vmatmul.msk.f32.gmra.mxu0 %vm342_vm13, %v1827_v10  ;;  %1125 = vmatmul.msk.f32.gmra.mxu2 %vm342_vm13, %v1847_v14 }
 0x154   : > { %1129 = vmatmul.msk.f32.gmra.mxu1 %vm342_vm13, %v1827_v10  ;;  %1133 = vmatmul.msk.f32.gmra.mxu3 %vm342_vm13, %v1847_v14 }
 0x1b8   : > { %v384_v35 = vpop.f32.mrf.mxu0 }
 0x1b9   : > { %v385_v18 = vadd.f32 %v384_v35, %v305_v8  ;;  %v425_v51 = vpop.f32.mrf.mxu1 }
 0x1ba   : > { %v426_v52 = vadd.f32 %v425_v51, %v305_v8  ;;  %v320_v8 = vpop.permute.xlu2 %319  ;;  %v330_v51 = vpop.permute.xlu1 %329 }
 0x1bb   : > { %452 = vst [vmem:[%s2111_s21] sm:$0xff] %v385_v18  ;;  %v500_v59 = vmul.f32 %v385_v18, %v385_v18 }
 0x1bc   : > { %453 = vst [vmem:[%s2111_s21 + $0x8] sm:$0xff] %v426_v52  ;;  %v468_v60 = vadd.f32 %v426_v52, %v385_v18  ;;  %v501_v61 = vmul.f32 %v426_v52, %v426_v52 }
 0x1be   : > { %469 = vadd.xlane.f32.xlu1 %v468_v60  ;;  %v396_v63 = vpop.f32.mrf.mxu2  ;;  %v516_v1 = vadd.f32 %v501_v61, %v500_v59 }
 0x1bf   : > { %v397_v2 = vadd.f32 %v396_v63, %v325_v62  ;;  %v437_v6 = vpop.f32.mrf.mxu3 }
 0x1c0   : > { %v438_v9 = vadd.f32 %v437_v6, %v325_v62  ;;  %517 = vadd.xlane.f32.xlu2 %v516_v1  ;;  %v387_v32 = vpop.f32.mrf.mxu0 }
 0x1c1   : > { %460 = vst [vmem:[%s2111_s21 + $0x40] sm:$0xff] %v397_v2  ;;  %v388_v34 = vadd.f32 %v387_v32, %v310_v15  ;;  %v428_v0 = vpop.f32.mrf.mxu1  ;;  %v508_v50 = vmul.f32 %v397_v2, %v397_v2 }
 0x1c2   : > { %461 = vst [vmem:[%s2111_s21 + $0x48] sm:$0xff] %v438_v9  ;;  %v429_v56 = vadd.f32 %v428_v0, %v310_v15  ;;  %v509_v7 = vmul.f32 %v438_v9, %v438_v9  ;;  %v480_v18 = vadd.f32 %v438_v9, %v397_v2 }
 0x1c3   : > { %454 = vst [vmem:[%s2111_s21 + $0x10] sm:$0xff] %v388_v34  ;;  %v502_v63 = vmul.f32 %v388_v34, %v388_v34 }
 0x1c4   : > { %455 = vst [vmem:[%s2111_s21 + $0x18] sm:$0xff] %v429_v56  ;;  %v528_v35 = vadd.f32 %v509_v7, %v508_v50  ;;  %v471_v59 = vadd.f32 %v429_v56, %v388_v34  ;;  %v503_v1 = vmul.f32 %v429_v56, %v429_v56  ;;  %v335_v7 = vpop.permute.xlu2 %334 }
 0x1c6   : > { %529 = vadd.xlane.f32.xlu0 %v528_v35  ;;  %481 = vadd.xlane.f32.xlu1 %v480_v18  ;;  %v399_v52 = vpop.f32.mrf.mxu2  ;;  %v519_v0 = vadd.f32 %v503_v1, %v502_v63  ;;  %v340_v1 = vpop.permute.xlu0 %339 }
 0x1c7   : > { %v400_v60 = vadd.f32 %v399_v52, %v330_v51  ;;  %v440_v61 = vpop.f32.mrf.mxu3 }
 0x1c8   : > { %v441_v62 = vadd.f32 %v440_v61, %v330_v51  ;;  %472 = vadd.xlane.f32.xlu2 %v471_v59  ;;  %v390_v15 = vpop.f32.mrf.mxu0 }
 0x1c9   : > { %462 = vst [vmem:[%s2111_s21 + $0x50] sm:$0xff] %v400_v60  ;;  %v391_v6 = vadd.f32 %v390_v15, %v315_v53  ;;  %v431_v32 = vpop.f32.mrf.mxu1 }
 0x1ca   : > { %463 = vst [vmem:[%s2111_s21 + $0x58] sm:$0xff] %v441_v62  ;;  %v432_v2 = vadd.f32 %v431_v32, %v315_v53  ;;  %v483_v18 = vadd.f32 %v441_v62, %v400_v60 }
 0x1cb   : > { %456 = vst [vmem:[%s2111_s21 + $0x20] sm:$0xff] %v391_v6  ;;  %v504_v9 = vmul.f32 %v391_v6, %v391_v6 }
 0x1cc   : > { %457 = vst [vmem:[%s2111_s21 + $0x28] sm:$0xff] %v432_v2  ;;  %v505_v50 = vmul.f32 %v432_v2, %v432_v2  ;;  %v474_v63 = vadd.f32 %v432_v2, %v391_v6 }
 0x1ce   : > { %520 = vadd.xlane.f32.xlu0 %v519_v0  ;;  %v402_v35 = vpop.f32.mrf.mxu2  ;;  %v522_v34 = vadd.f32 %v505_v50, %v504_v9 }
 0x1cf   : > { %v403_v56 = vadd.f32 %v402_v35, %v335_v7  ;;  %v443_v51 = vpop.f32.mrf.mxu3 }
 0x1d0   : > { %v444_v52 = vadd.f32 %v443_v51, %v335_v7  ;;  %484 = vadd.xlane.f32.xlu2 %v483_v18  ;;  %523 = vadd.xlane.f32.xlu1 %v522_v34  ;;  %v393_v53 = vpop.f32.mrf.mxu0 }
 0x1d1   : > { %464 = vst [vmem:[%s2111_s21 + $0x60] sm:$0xff] %v403_v56  ;;  %v394_v59 = vadd.f32 %v393_v53, %v320_v8  ;;  %v434_v61 = vpop.f32.mrf.mxu1  ;;  %v510_v53 = vmul.f32 %v400_v60, %v400_v60  ;;  %v512_v3 = vmul.f32 %v403_v56, %v403_v56 }
 0x1d2   : > { %465 = vst [vmem:[%s2111_s21 + $0x68] sm:$0xff] %v444_v52  ;;  %v435_v15 = vadd.f32 %v434_v61, %v320_v8  ;;  %v486_v51 = vadd.f32 %v444_v52, %v403_v56  ;;  %v511_v61 = vmul.f32 %v441_v62, %v441_v62 }
 0x1d3   : > { %458 = vst [vmem:[%s2111_s21 + $0x30] sm:$0xff] %v394_v59  ;;  %v506_v18 = vmul.f32 %v394_v59, %v394_v59 }
 0x1d4   : > { %459 = vst [vmem:[%s2111_s21 + $0x38] sm:$0xff] %v435_v15  ;;  %v477_v9 = vadd.f32 %v435_v15, %v394_v59  ;;  %v507_v34 = vmul.f32 %v435_v15, %v435_v15 }
 0x1d6   : > { %475 = vadd.xlane.f32.xlu0 %v474_v63  ;;  %v405_v32 = vpop.f32.mrf.mxu2  ;;  %v525_v8 = vadd.f32 %v507_v34, %v506_v18  ;;  %v531_v63 = vadd.f32 %v511_v61, %v510_v53 }
 0x1d7   : > { %v406_v0 = vadd.f32 %v405_v32, %v340_v1  ;;  %v446_v50 = vpop.f32.mrf.mxu3  ;;  %v513_v32 = vmul.f32 %v444_v52, %v444_v52 }
 0x1d8   : > { %v447_v7 = vadd.f32 %v446_v50, %v340_v1  ;;  %478 = vadd.xlane.f32.xlu2 %v477_v9 }
 0x1d9   : > { %466 = vst [vmem:[%s2111_s21 + $0x70] sm:$0xff] %v406_v0  ;;  %v514_v6 = vmul.f32 %v406_v0, %v406_v0  ;;  %v534_v9 = vadd.f32 %v513_v32, %v512_v3 }
 0x1da   : > { %467 = vst [vmem:[%s2111_s21 + $0x78] sm:$0xff] %v447_v7  ;;  %v489_v35 = vadd.f32 %v447_v7, %v406_v0  ;;  %v515_v2 = vmul.f32 %v447_v7, %v447_v7 }
 0x1dc   : > { %490 = vadd.xlane.f32.xlu1 %v489_v35  ;;  %v537_v1 = vadd.f32 %v515_v2, %v514_v6 }
 0x1de   : > { %487 = vadd.xlane.f32.xlu0 %v486_v51 }
 0x1e0   : > { %526 = vadd.xlane.f32.xlu2 %v525_v8 }
 0x1e4   : > { %532 = vadd.xlane.f32.xlu1 %v531_v63 }
 0x1e6   : > { %538 = vadd.xlane.f32.xlu0 %v537_v1 }
 0x1e8   : > { %535 = vadd.xlane.f32.xlu2 %v534_v9 }
 0x231   : > { %v470_v50 = vpop.xlane.xlu1 %469 }
 0x232   : > { %v492_v59 = vadd.f32 %v1665_v49, %v470_v50  }
 0x233   : > { %v518_v15 = vpop.xlane.xlu2 %517 }
 0x234   : > { %v540_v35 = vadd.f32 %v1633_v41, %v518_v15   ;;  %v2187_v15 = vmul.f32 (%p2146_p1), %v492_v59, %v1783_v54 }
 0x236   :  { %v572_v5 = vmul.f32 (%p2146_p1), %v540_v35, %v1783_v54  ;;  %v580_v22 = vmul.f32 (%p2146_p1), %v2187_v15, %v2187_v15 }
 0x238   :  { %v588_v19 = vsub.f32 (%p2146_p1), %v572_v5, %v580_v22 }
 0x239   : > { %v530_v18 = vpop.xlane.xlu0 %529  ;;  %v482_v60 = vpop.xlane.xlu1 %481 }
 0x23a   : > { %v544_v62 = vadd.f32 %v1617_v38, %v530_v18   ;;  %v496_v0 = vadd.f32 %v1649_v45, %v482_v60  }
 0x23b   : > { %v473_v7 = vpop.xlane.xlu2 %472 }
 0x23c   : > { %v493_v56 = vadd.f32 %v1661_v48, %v473_v7   ;;  %v576_v13 = vmul.f32 (%p2146_p1), %v544_v62, %v1783_v54 }
 0x23e   :  { %v2190_v18 = vmul.f32 (%p2146_p1), %v493_v56, %v1783_v54 }
 0x240   :  { %v581_v23 = vmul.f32 (%p2146_p1), %v2190_v18, %v2190_v18 }
 0x241   : > { %v521_v52 = vpop.xlane.xlu0 %520 }
 0x242   : > { %v541_v34 = vadd.f32 %v1629_v40, %v521_v52   ;;  %v2199_v52 = vmul.f32 (%p2146_p1), %v496_v0, %v1783_v54 }
 0x243   : > { %v485_v3 = vpop.xlane.xlu2 %484  ;;  %v524_v51 = vpop.xlane.xlu1 %523 }
 0x244   : > { %v497_v8 = vadd.f32 %v1645_v44, %v485_v3   ;;  %v542_v53 = vadd.f32 %v1625_v58, %v524_v51   ;;  %v573_v10 = vmul.f32 (%p2146_p1), %v541_v34, %v1783_v54  ;;  %v584_v30 = vmul.f32 (%p2146_p1), %v2199_v52, %v2199_v52 }
 0x246   :  { %v2202_v3 = vmul.f32 (%p2146_p1), %v497_v8, %v1783_v54  ;;  %v574_v11 = vmul.f32 (%p2146_p1), %v542_v53, %v1783_v54  ;;  %v589_v25 = vsub.f32 (%p2146_p1), %v573_v10, %v581_v23  ;;  %v592_v28 = vsub.f32 (%p2146_p1), %v576_v13, %v584_v30 }
 0x248   :  { %v585_v16 = vmul.f32 (%p2146_p1), %v2202_v3, %v2202_v3 }
 0x249   : > { %v476_v49 = vpop.xlane.xlu0 %475 }
 0x24a   : > { %v494_v61 = vadd.f32 %v1657_v47, %v476_v49   ;;  %v2729_v49 = vmov %v492_v59 }
 0x24b   : > { %v479_v41 = vpop.xlane.xlu2 %478  ;;  %v2261_v49 = vld [vmem:[%s2683_s7 + $0x10] sm:$0xff] (%p2146_p1) }
 0x24c   : > { %v495_v6 = vadd.f32 %v1653_v46, %v479_v41   ;;  %v2721_v41 = vmov %v540_v35  ;;  %v2727_v47 = vmov %v494_v61  ;;  %v2193_v60 = vmul.f32 (%p2146_p1), %v494_v61, %v1783_v54  ;;  %v2266_v61 = vld [vmem:[%s2683_s7 + $0x18] sm:$0xff] (%p2146_p1) }
 0x24d   :  { %v2271_v41 = vld [vmem:[%s2684_s8] sm:$0xff] (%p2146_p1) }
 0x24e   : > { %v2726_v46 = vmov %v495_v6  ;;  %v2196_v7 = vmul.f32 (%p2146_p1), %v495_v6, %v1783_v54  ;;  %v582_v24 = vmul.f32 (%p2146_p1), %v2193_v60, %v2193_v60 }
 0x24f   : > { %v491_v38 = vpop.xlane.xlu1 %490 }
 0x250   : > { %v499_v2 = vadd.f32 %v1637_v42, %v491_v38   ;;  %v2717_v38 = vmov %v544_v62  ;;  %v583_v29 = vmul.f32 (%p2146_p1), %v2196_v7, %v2196_v7  ;;  %v590_v26 = vsub.f32 (%p2146_p1), %v574_v11, %v582_v24 }
 0x251   : > { %v488_v45 = vpop.xlane.xlu0 %487  ;;  %v2279_v38 = vld [vmem:[%s2684_s8 + $0x8] sm:$0xff] (%p2146_p1) }
 0x252   : > { %v498_v63 = vadd.f32 %v1641_v43, %v488_v45   ;;  %v2722_v42 = vmov %v499_v2  ;;  %v2725_v45 = vmov %v496_v0  ;;  %v2208_v4 = vmul.f32 (%p2146_p1), %v499_v2, %v1783_v54  ;;  %v2284_v2 = vld [vmem:[%s2684_s8 + $0x10] sm:$0xff] (%p2146_p1) }
 0x253   : > { %v527_v48 = vpop.xlane.xlu2 %526  ;;  %v600_v42 = vmax.f32 (%p2146_p1), %v592_v28, 0.0  ;;  %v2289_v45 = vld [vmem:[%s2684_s8 + $0x18] sm:$0xff] (%p2146_p1) }
 0x254   : > { %v543_v32 = vadd.f32 %v1621_v39, %v527_v48   ;;  %v2723_v43 = vmov %v498_v63  ;;  %v2728_v48 = vmov %v493_v56  ;;  %v2205_v51 = vmul.f32 (%p2146_p1), %v498_v63, %v1783_v54 }
 0x255   :  { %v587_v17 = vmul.f32 (%p2146_p1), %v2208_v4, %v2208_v4  ;;  %v2242_v56 = vadd.f32 (%p2146_p1), 1e-05, %v600_v42 }
 0x256   : > { %v2718_v39 = vmov %v543_v32  ;;  %v575_v12 = vmul.f32 (%p2146_p1), %v543_v32, %v1783_v54 }
 0x257   : > { %v533_v40 = vpop.xlane.xlu1 %532  ;;  %vm658_vm2 = vweird.f32 (%p2146_p1), %v2242_v56 }
 0x258   : > { %v545_v1 = vadd.f32 %v1613_v37, %v533_v40   ;;  %v2720_v40 = vmov %v541_v34  ;;  %v591_v27 = vsub.f32 (%p2146_p1), %v575_v12, %v583_v29  ;;  %v2248_v34 = vld [vmem:[%s2683_s7] sm:$0xff] (%p2146_p1) }
 0x259   : > { %v539_v44 = vpop.xlane.xlu0 %538 }
 0x25a   : > { %v547_v9 = vadd.f32 %v1605_v36, %v539_v44   ;;  %v2716_v37 = vmov %v545_v1  ;;  %v2724_v44 = vmov %v497_v8  ;;  %209 = sbr.rel (!%p2146_p1) target bundleno = 173 (0xad), region = 94  ;;  %v577_v14 = vmul.f32 (%p2146_p1), %v545_v1, %v1783_v54  ;;  %v2253_v8 = vld [vmem:[%s2683_s7 + $0x8] sm:$0xff] (%p2146_p1) }
 0x25b   : > { %v536_v58 = vpop.xlane.xlu2 %535  ;;  %v598_v37 = vmax.f32 (%p2146_p1), %v590_v26, 0.0  ;;  %v599_v39 = vmax.f32 (%p2146_p1), %v591_v27, 0.0 }
 0x25c   : > { %v546_v50 = vadd.f32 %v1609_v57, %v536_v58   ;;  %v2714_v36 = vmov %v547_v9  ;;  %v2719_v58 = vmov %v542_v53  ;;  %v579_v21 = vmul.f32 (%p2146_p1), %v547_v9, %v1783_v54 }
 0x25d   :  { %v593_v31 = vsub.f32 (%p2146_p1), %v577_v14, %v585_v16  ;;  %v596_v36 = vmax.f32 (%p2146_p1), %v588_v19, 0.0  ;;  %v2238_v35 = vadd.f32 (%p2146_p1), 1e-05, %v598_v37  ;;  %v2240_v0 = vadd.f32 (%p2146_p1), 1e-05, %v599_v39 }
 0x25e   : > { %v2715_v57 = vmov %v546_v50  ;;  %v578_v20 = vmul.f32 (%p2146_p1), %v546_v50, %v1783_v54  ;;  %v586_v54 = vmul.f32 (%p2146_p1), %v2205_v51, %v2205_v51  ;;  %v595_v33 = vsub.f32 (%p2146_p1), %v579_v21, %v587_v17 }
 0x25f   :  { %v597_v57 = vmax.f32 %v589_v25, 0.0  ;;  %v601_v43 = vmax.f32 %v593_v31, 0.0  ;;  %v2234_v47 = vadd.f32 1e-05, %v596_v36  ;;  %vm638_vm0 = vweird.f32 %v2238_v35 }
 0x260   :  { %v594_v55 = vsub.f32 %v578_v20, %v586_v54  ;;  %v603_v62 = vmax.f32 %v595_v33, 0.0  ;;  %vm648_vm1 = vweird.f32 %v2240_v0 }
 0x261   :  { %v2236_v59 = vadd.f32 1e-05, %v597_v57  ;;  %1414 = vrsqrt.f32 %v2234_v47  ;;  %v2255_v53 = vadd.f32 1e-05, %v601_v43  ;;  %vm618_vm14 = vweird.f32 %v2234_v47 }
 0x262   :  { %v602_v46 = vmax.f32 %v594_v55, 0.0  ;;  %v2291_v63 = vadd.f32 1e-05, %v603_v62 }
 0x263   :  { %1416 = vrsqrt.f32 %v2236_v59  ;;  %vm628_vm15 = vweird.f32 %v2236_v59  ;;  %vm668_vm3 = vweird.f32 %v2255_v53 }
 0x264   :  { %v2273_v6 = vadd.f32 1e-05, %v602_v46  ;;  %1418 = vrsqrt.f32 %v2238_v35  ;;  %v548_v46 = vld [vmem:[%s2679_s3] sm:$0xff] }
 0x265   :  { %1420 = vrsqrt.f32 %v2240_v0 }
 0x266   :  { %1422 = vrsqrt.f32 %v2242_v56  ;;  %vm678_vm6 = vweird.f32 %v2273_v6 }
 0x267   :  { %1424 = vrsqrt.f32 %v2255_v53  ;;  %v2296_v48 = vpop.eup %1414 }
 0x268   :  { %1426 = vrsqrt.f32 %v2273_v6  ;;  %v613_v40 = vmul.f32 %v2296_v48, %v2234_v47  ;;  %vm619_vm4 = vweird.f32 %v2296_v48 }
 0x269   :  { %v2300_v32 = vpop.eup %1416  ;;  %1428 = vrsqrt.f32 %v2291_v63  ;;  %vm2351_vm12 = vmor %vm618_vm14, %vm619_vm4  ;;  %vm2744_vm4 = vweird.f32 %v2291_v63 }
 0x26a   :  { %v2307_v1 = vpop.eup %1418  ;;  %v623_v44 = vmul.f32 %v2300_v32, %v2236_v59  ;;  %v614_v58 = vmul.f32 %v2296_v48, %v613_v40  ;;  %vm629_vm5 = vweird.f32 %v2300_v32 }
 0x26b   :  { %v2314_v9 = vpop.eup %1420  ;;  %v633_v50 = vmul.f32 %v2307_v1, %v2238_v35  ;;  %vm639_vm7 = vweird.f32 %v2307_v1  ;;  %vm2362_vm11 = vmor %vm628_vm15, %vm629_vm5 }
 0x26c   :  { %v2322_v5 = vpop.eup %1422  ;;  %v624_v10 = vmul.f32 %v2300_v32, %v623_v44  ;;  %v643_v11 = vmul.f32 %v2314_v9, %v2240_v0  ;;  %vm649_vm8 = vweird.f32 %v2314_v9  ;;  %v615_v13 = vmul.f32 0.5, %v614_v58  ;;  %vm2372_vm14 = vmor %vm638_vm0, %vm639_vm7  ;;  %v549_v44 = vld [vmem:[%s2679_s3 + $0x8] sm:$0xff] }
 0x26d   :  { %v2329_v12 = vpop.eup %1424  ;;  %v634_v14 = vmul.f32 %v2307_v1, %v633_v50  ;;  %v653_v20 = vmul.f32 %v2322_v5, %v2242_v56  ;;  %vm659_vm9 = vweird.f32 %v2322_v5  ;;  %vm2389_vm15 = vmor %vm648_vm1, %vm649_vm8 }
 0x26e   :  { %v2335_v21 = vpop.eup %1426  ;;  %v625_v22 = vmul.f32 0.5, %v624_v10  ;;  %v644_v23 = vmul.f32 %v2314_v9, %v643_v11  ;;  %v663_v24 = vmul.f32 %v2329_v12, %v2255_v53  ;;  %vm669_vm10 = vweird.f32 %v2329_v12  ;;  %vm2407_vm0 = vmor %vm658_vm2, %vm659_vm9 }
 0x26f   :  { %v2342_v29 = vpop.eup %1428  ;;  %v616_v30 = vsub.f32 1.5, %v615_v13  ;;  %v635_v16 = vmul.f32 0.5, %v634_v14  ;;  %v654_v54 = vmul.f32 %v2322_v5, %v653_v20  ;;  %v673_v17 = vmul.f32 %v2335_v21, %v2273_v6  ;;  %v551_v13 = vld [vmem:[%s2679_s3 + $0x18] sm:$0xff]  ;;  %vm2426_vm1 = vmor %vm668_vm3, %vm669_vm10 }
 0x270   :  { %v626_v25 = vsub.f32 1.5, %v625_v22  ;;  %v645_v26 = vmul.f32 0.5, %v644_v23  ;;  %v664_v27 = vmul.f32 %v2329_v12, %v663_v24  ;;  %vm679_vm13 = vweird.f32 %v2335_v21  ;;  %v553_v23 = vld [vmem:[%s2679_s3 + $0x28] sm:$0xff] }
 0x271   :  { %v617_v28 = vmul.f32 %v2296_v48, %v616_v30  ;;  %v636_v55 = vsub.f32 1.5, %v635_v16  ;;  %v655_v33 = vmul.f32 0.5, %v654_v54  ;;  %v674_v36 = vmul.f32 %v2335_v21, %v673_v17  ;;  %vm2442_vm3 = vmor %vm678_vm6, %vm679_vm13  ;;  %v554_v54 = vld [vmem:[%s2679_s3 + $0x30] sm:$0xff] }
 0x272   :  { %v627_v57 = vmul.f32 %v2300_v32, %v626_v25  ;;  %v646_v39 = vsub.f32 1.5, %v645_v26  ;;  %v665_v42 = vmul.f32 0.5, %v664_v27  ;;  %v683_v43 = vmul.f32 %v2342_v29, %v2291_v63  ;;  %v2462_v25 = vld [vmem:[%s2680_s4] sm:$0xff]  ;;  %v2467_v26 = vld [vmem:[%s2680_s4 + $0x8] sm:$0xff] }
 0x273   :  { %v621_v47 = vsel %vm2351_vm12, %v2296_v48, %v617_v28  ;;  %v637_v59 = vmul.f32 %v2307_v1, %v636_v55  ;;  %v656_v62 = vsub.f32 1.5, %v655_v33  ;;  %v675_v40 = vmul.f32 0.5, %v674_v36  ;;  %v550_v48 = vld [vmem:[%s2679_s3 + $0x10] sm:$0xff]  ;;  %v2484_v33 = vld [vmem:[%s2680_s4 + $0x18] sm:$0xff]  ;;  %v2513_v63 = vld [vmem:[%s2680_s4 + $0x20] sm:$0xff] }
 0x274   :  { %v631_v58 = vsel %vm2362_vm11, %v2300_v32, %v627_v57  ;;  %v647_v0 = vmul.f32 %v2314_v9, %v646_v39  ;;  %v666_v10 = vsub.f32 1.5, %v665_v42  ;;  %v684_v11 = vmul.f32 %v2342_v29, %v683_v43  ;;  %v552_v32 = vld [vmem:[%s2679_s3 + $0x20] sm:$0xff]  ;;  %v2479_v55 = vld [vmem:[%s2680_s4 + $0x10] sm:$0xff]  ;;  %v2518_v42 = vld [vmem:[%s2680_s4 + $0x28] sm:$0xff] }
 0x275   :  { %v641_v14 = vsel %vm2372_vm14, %v2307_v1, %v637_v59  ;;  %v657_v56 = vmul.f32 %v2322_v5, %v656_v62  ;;  %v676_v22 = vsub.f32 1.5, %v675_v40  ;;  %vm689_vm2 = vweird.f32 %v2342_v29 }
 0x276   :  { %v651_v1 = vsel %vm2389_vm15, %v2314_v9, %v647_v0  ;;  %v667_v24 = vmul.f32 %v2329_v12, %v666_v10  ;;  %v685_v30 = vmul.f32 0.5, %v684_v11  ;;  %v2446_v16 = vmul.f32 %v621_v47, %v548_v46  ;;  %vm2493_vm5 = vmor %vm2744_vm4, %vm689_vm2  ;;  %v2534_v47 = vld [vmem:[%s2680_s4 + $0x30] sm:$0xff] }
 0x277   :  { %v661_v9 = vsel %vm2407_vm0, %v2322_v5, %v657_v56  ;;  %v677_v17 = vmul.f32 %v2335_v21, %v676_v22  ;;  %v2455_v19 = vmul.f32 %v631_v58, %v549_v44  ;;  %v2457_v6 = vmul.f32 %v641_v14, %v550_v48 }
 0x278   :  { %v671_v5 = vsel %vm2426_vm1, %v2329_v12, %v667_v24  ;;  %v686_v27 = vsub.f32 1.5, %v685_v30  ;;  %v2472_v28 = vmul.f32 %v651_v1, %v551_v13  ;;  %v2474_v31 = vmul.f32 %v661_v9, %v552_v32 }
 0x279   :  { %v681_v36 = vsel %vm2442_vm3, %v2335_v21, %v677_v17  ;;  %v2497_v57 = vmul.f32 %v671_v5, %v553_v23  ;;  %v2501_v37 = vmul.f32 %v2446_v16, %v2187_v15  ;;  %v2505_v39 = vmul.f32 %v2455_v19, %v2190_v18  ;;  %v555_v21 = vld [vmem:[%s2679_s3 + $0x38] sm:$0xff] }
 0x27a   :  { %v687_v15 = vmul.f32 %v2342_v29, %v686_v27  ;;  %v2521_v43 = vmul.f32 %v681_v36, %v554_v54  ;;  %v2525_v18 = vmul.f32 %v2457_v6, %v2193_v60  ;;  %v2529_v46 = vmul.f32 %v2472_v28, %v2196_v7 }
 0x27b   :  { %v2538_v59 = vmul.f32 %v2474_v31, %v2199_v52  ;;  %v2542_v35 = vmul.f32 %v2497_v57, %v2202_v3  ;;  %v708_v60 = vsub.f32 %v2462_v25, %v2501_v37  ;;  %v709_v7 = vsub.f32 %v2467_v26, %v2505_v39 }
 0x27c   :  { %v691_v62 = vsel %vm2493_vm5, %v2342_v29, %v687_v15  ;;  %v2553_v40 = vmul.f32 %v2521_v43, %v2205_v51  ;;  %v710_v52 = vsub.f32 %v2479_v55, %v2525_v18  ;;  %v711_v3 = vsub.f32 %v2484_v33, %v2529_v46  ;;  %v2568_v29 = vld [vmem:[%s2680_s4 + $0x38] sm:$0xff] }
 0x27d   :  { %v2559_v44 = vmul.f32 %v691_v62, %v555_v21  ;;  %v712_v48 = vsub.f32 %v2513_v63, %v2538_v59  ;;  %v713_v58 = vsub.f32 %v2518_v42, %v2542_v35 }
 0x27e   :  { %v714_v51 = vsub.f32 %v2534_v47, %v2553_v40 }
 0x27f   :  { %v2574_v0 = vmul.f32 %v2559_v44, %v2208_v4 }
 0x281   :  { %v715_v50 = vsub.f32 %v2568_v29, %v2574_v0 }
 0x282 LB: > { %v1677_v10 = vmov 0   ;;  %s1152_s4 = sshll.u32 %s1673_s16, 7  ;;  %vm897_vm6 = vcmask 523264   ;;  %s1153_s18 = sshll.u32 %s1673_s16, 6  ;;  %s1673_s16 = sphi %s2578_s16, %s729_s16  }
 0x283   : > { %1432 = vset.pattern.permute.xlu2 %v1677_v10  ;;  %1431 = vset.pattern.permute.xlu1 %v1677_v10  ;;  %s2620_s17 = scalar_lea.vmem [#allocation2], %s1152_s4  ;;  %s2650_s21 = scalar_lea.vmem %s2676_s0, %s1153_s18 }
 0x284   : > { %1430 = vset.pattern.permute.xlu0 %v1677_v10  ;;  %837 = vperm.xlu2 %1432, %v714_v51   ;;  %v747_v11 = vld [vmem:[%s2620_s17 + $0x70] sm:$0xff]  ;;  %v748_v13 = vld [vmem:[%s2620_s17 + $0x78] sm:$0xff]  ;;  %v745_v30 = vld [vmem:[%s2620_s17 + $0x60] sm:$0xff]  ;;  %s2654_s22 = scalar_lea.vmem [#allocation3], %s1153_s18  ;;  %s729_s16 = sadd.s32 1, %s1673_s16  }
 0x285   : > { %842 = vperm.xlu1 %1431, %v715_v50   ;;  %786 = vperm.xlu0 %1430, %v2559_v44   ;;  %v746_v54 = vld [vmem:[%s2620_s17 + $0x68] sm:$0xff]  ;;  %v741_v36 = vld [vmem:[%s2620_s17 + $0x40] sm:$0xff]  ;;  %v743_v10 = vld [vmem:[%s2620_s17 + $0x50] sm:$0xff]  ;;  %p726_p2 = scmp.ge.s32.totalorder %s729_s16, 2  }
 0x286   : > { %v742_v21 = vld [vmem:[%s2620_s17 + $0x48] sm:$0xff]  ;;  %s1003_s24 = sshll.u32 (%p726_p2), %s2685_s9, 4  ;;  %s1678_s25 = smov (%p726_p2), [#allocation3]   ;;  %s1004_s24 = int_to_ptr.hbm [resolvable:$true] %s1003_s24 }
 0x287   :  { %s1001_s26 = sshll.u32 (%p726_p2), %s1678_s25, 4  ;;  %s1679_s27 = smov (%p726_p2), 256   ;;  %s1002_s26 = int_to_ptr.vmem [resolvable:$true] %s1001_s26 }
 0x288   :  { %s1680_s28 = smov (%p726_p2), 16  }
 0x28c   : > { %771 = vperm.xlu2 %1432, %v2474_v31  }
 0x28d   : > { %776 = vperm.xlu1 %1431, %v2497_v57   ;;  %781 = vperm.xlu0 %1430, %v2521_v43  }
 0x294   : > { %827 = vperm.xlu2 %1432, %v712_v48  }
 0x295   : > { %766 = vperm.xlu1 %1431, %v2472_v28   ;;  %832 = vperm.xlu0 %1430, %v713_v58  }
 0x29c   : > { %756 = vperm.xlu2 %1432, %v2455_v19  }
 0x29d   : > { %822 = vperm.xlu1 %1431, %v711_v3   ;;  %761 = vperm.xlu0 %1430, %v2457_v6  }
 0x2a4   : > { %812 = vperm.xlu2 %1432, %v709_v7  }
 0x2a5   : > { %751 = vperm.xlu1 %1431, %v2446_v16   ;;  %817 = vperm.xlu0 %1430, %v710_v52  }
 0x2ac   : > { %884 = vperm.xlu2 %1432, %v2279_v38  }
 0x2ad   : > { %879 = vperm.xlu1 %1431, %v2271_v41   ;;  %807 = vperm.xlu0 %1430, %v708_v60  }
 0x2b5   : > { %894 = vperm.xlu1 %1431, %v2289_v45   ;;  %889 = vperm.xlu0 %1430, %v2284_v2  }
 0x2de   : > { %v838_v4 = vpop.permute.xlu2 %837 }
 0x2e6   : > { %v772_v32 = vpop.permute.xlu2 %771 }
 0x2ee   : > { %v828_v12 = vpop.permute.xlu2 %827 }
 0x2f7   : > { %v843_v14 = vpop.permute.xlu1 %842  ;;  %v787_v56 = vpop.permute.xlu0 %786 }
 0x2f8   : > { %v803_v20 = vmul.f32 %v787_v56, %v747_v11  ;;  %v804_v22 = vmul.f32 %v787_v56, %v748_v13  ;;  %v744_v11 = vld [vmem:[%s2620_s17 + $0x58] sm:$0xff]  ;;  %v797_v13 = vmul.f32 %v772_v32, %v741_v36  ;;  %v739_v36 = vld [vmem:[%s2620_s17 + $0x30] sm:$0xff] }
 0x2fa   : > { %v859_v23 = vadd.f32 %v843_v14, %v803_v20  ;;  %v860_v1 = vadd.f32 %v843_v14, %v804_v22  ;;  %v798_v20 = vmul.f32 %v772_v32, %v742_v21 }
 0x2fc   : > { %v875_v24 = vmax.f32 %v859_v23, 0.0  ;;  %v876_v53 = vmax.f32 %v860_v1, 0.0 }
 0x2fe   : > { %918 = vmatpush.msra.mxu0 %v875_v24  ;;  %1163 = vmatpush.msra.mxu2 %v875_v24 }
 0x2ff   : > { %947 = vmatpush.msra.mxu1 %v876_v53  ;;  %1171 = vmatpush.msra.mxu3 %v876_v53  ;;  %v777_v9 = vpop.permute.xlu1 %776  ;;  %v782_v17 = vpop.permute.xlu0 %781  ;;  %v853_v53 = vadd.f32 %v828_v12, %v797_v13 }
 0x300   : > { %v801_v5 = vmul.f32 %v782_v17, %v745_v30  ;;  %v802_v27 = vmul.f32 %v782_v17, %v746_v54  ;;  %v799_v22 = vmul.f32 %v777_v9, %v743_v10  ;;  %v800_v23 = vmul.f32 %v777_v9, %v744_v11 }
 0x301   : > { %v869_v32 = vmax.f32 %v853_v53, 0.0 }
 0x302   : > { %v857_v15 = vadd.f32 %v838_v4, %v801_v5  ;;  %v858_v62 = vadd.f32 %v838_v4, %v802_v27  ;;  %v854_v4 = vadd.f32 %v828_v12, %v798_v20  ;;  %v757_v27 = vpop.permute.xlu2 %756 }
 0x304   : > { %v873_v14 = vmax.f32 %v857_v15, 0.0  ;;  %v874_v56 = vmax.f32 %v858_v62, 0.0  ;;  %v740_v15 = vld [vmem:[%s2620_s17 + $0x38] sm:$0xff]  ;;  %v870_v9 = vmax.f32 %v854_v4, 0.0 }
 0x306   : > { %919 = vmatpush.msra.mxu0 %v873_v14  ;;  %1164 = vmatpush.msra.mxu2 %v873_v14  ;;  %v735_v14 = vld [vmem:[%s2620_s17 + $0x10] sm:$0xff] }
 0x307   : > { %948 = vmatpush.msra.mxu1 %v874_v56  ;;  %1172 = vmatpush.msra.mxu3 %v874_v56  ;;  %v767_v1 = vpop.permute.xlu1 %766  ;;  %v833_v24 = vpop.permute.xlu0 %832  ;;  %v736_v56 = vld [vmem:[%s2620_s17 + $0x18] sm:$0xff]  ;;  %v791_v53 = vmul.f32 %v757_v27, %v735_v14 }
 0x308   : > { %v855_v30 = vadd.f32 %v833_v24, %v799_v22  ;;  %v856_v54 = vadd.f32 %v833_v24, %v800_v23  ;;  %v795_v21 = vmul.f32 %v767_v1, %v739_v36  ;;  %v796_v62 = vmul.f32 %v767_v1, %v740_v15  ;;  %v737_v23 = vld [vmem:[%s2620_s17 + $0x20] sm:$0xff]  ;;  %v738_v24 = vld [vmem:[%s2620_s17 + $0x28] sm:$0xff] }
 0x309   : > { %v792_v1 = vmul.f32 %v757_v27, %v736_v56 }
 0x30a   : > { %v871_v17 = vmax.f32 %v855_v30, 0.0  ;;  %v872_v5 = vmax.f32 %v856_v54, 0.0  ;;  %v813_v30 = vpop.permute.xlu2 %812 }
 0x30c   : > { %920 = vmatpush.msra.mxu0 %v871_v17  ;;  %1165 = vmatpush.msra.mxu2 %v871_v17 }
 0x30d   : > { %949 = vmatpush.msra.mxu1 %v872_v5  ;;  %1173 = vmatpush.msra.mxu3 %v872_v5  ;;  %v847_v5 = vadd.f32 %v813_v30, %v791_v53 }
 0x30e   : > { %921 = vmatpush.msra.mxu0 %v869_v32  ;;  %1166 = vmatpush.msra.mxu2 %v869_v32  ;;  %v848_v32 = vadd.f32 %v813_v30, %v792_v1  ;;  %v971_v30 = vld [vmem:[%s2650_s21] sm:$0xff] }
 0x30f   : > { %950 = vmatpush.msra.mxu1 %v870_v9  ;;  %1174 = vmatpush.msra.mxu3 %v870_v9  ;;  %v823_v12 = vpop.permute.xlu1 %822  ;;  %v762_v10 = vpop.permute.xlu0 %761 }
 0x310   : > { %v851_v11 = vadd.f32 %v823_v12, %v795_v21  ;;  %v852_v13 = vadd.f32 %v823_v12, %v796_v62  ;;  %v793_v54 = vmul.f32 %v762_v10, %v737_v23  ;;  %v794_v4 = vmul.f32 %v762_v10, %v738_v24  ;;  %v733_v12 = vld [vmem:[%s2620_s17] sm:$0xff] }
 0x311   : > { %v864_v27 = vmax.f32 %v848_v32, 0.0 }
 0x312   : > { %v867_v20 = vmax.f32 %v851_v11, 0.0  ;;  %v868_v22 = vmax.f32 %v852_v13, 0.0  ;;  %v734_v11 = vld [vmem:[%s2620_s17 + $0x8] sm:$0xff]  ;;  %v863_v13 = vmax.f32 %v847_v5, 0.0 }
 0x314   : > { %922 = vmatpush.msra.mxu0 %v867_v20  ;;  %1167 = vmatpush.msra.mxu2 %v867_v20 }
 0x315   : > { %951 = vmatpush.msra.mxu1 %v868_v22  ;;  %1175 = vmatpush.msra.mxu3 %v868_v22 }
 0x317   : > { %v818_v17 = vpop.permute.xlu0 %817  ;;  %v752_v62 = vpop.permute.xlu1 %751 }
 0x318   : > { %v849_v36 = vadd.f32 %v818_v17, %v793_v54  ;;  %v850_v15 = vadd.f32 %v818_v17, %v794_v4  ;;  %v789_v14 = vmul.f32 %v752_v62, %v733_v12  ;;  %v790_v56 = vmul.f32 %v752_v62, %v734_v11  ;;  %v972_v17 = vld [vmem:[%s2650_s21 + $0x8] sm:$0xff] }
 0x319   : > { %v976_v11 = vld [vmem:[%s2650_s21 + $0x28] sm:$0xff] }
 0x31a   : > { %v865_v9 = vmax.f32 %v849_v36, 0.0  ;;  %v866_v21 = vmax.f32 %v850_v15, 0.0 }
 0x31c   : > { %923 = vmatpush.msra.mxu0 %v865_v9  ;;  %1168 = vmatpush.msra.mxu2 %v865_v9 }
 0x31d   : > { %952 = vmatpush.msra.mxu1 %v866_v21  ;;  %1176 = vmatpush.msra.mxu3 %v866_v21  ;;  %v975_v21 = vld [vmem:[%s2650_s21 + $0x20] sm:$0xff] }
 0x31e   : > { %924 = vmatpush.msra.mxu0 %v863_v13  ;;  %1169 = vmatpush.msra.mxu2 %v863_v13  ;;  %v885_v13 = vpop.permute.xlu2 %884 }
 0x31f   : > { %953 = vmatpush.msra.mxu1 %v864_v27  ;;  %1177 = vmatpush.msra.mxu3 %v864_v27  ;;  %v808_v10 = vpop.permute.xlu0 %807  ;;  %v880_v53 = vpop.permute.xlu1 %879 }
 0x320   : > { %v845_v20 = vadd.f32 %v808_v10, %v789_v14  ;;  %v846_v22 = vadd.f32 %v808_v10, %v790_v56  ;;  %v973_v56 = vld [vmem:[%s2650_s21 + $0x10] sm:$0xff] }
 0x322   : > { %v861_v23 = vmax.f32 %v845_v20, 0.0  ;;  %v862_v24 = vmax.f32 %v846_v22, 0.0 }
 0x324   : > { %925 = vmatpush.msra.mxu0 %v861_v23  ;;  %1170 = vmatpush.msra.mxu2 %v861_v23  ;;  %v974_v23 = vld [vmem:[%s2650_s21 + $0x18] sm:$0xff] }
 0x325   : > { %954 = vmatpush.msra.mxu1 %v862_v24  ;;  %1178 = vmatpush.msra.mxu3 %v862_v24 }
 0x326   : > { %1138 = vmatmul.msk.f32.vlgmr.msra.gmra.mxu0 %vm897_vm6, %v2248_v34  ;;  %1140 = vmatmul.msk.f32.vlgmr.msra.gmra.mxu2 %vm897_vm6, %v2261_v49 }
 0x327   : > { %1142 = vmatmul.msk.f32.vlgmr.msra.gmra.mxu1 %vm897_vm6, %v2248_v34  ;;  %1144 = vmatmul.msk.f32.vlgmr.msra.gmra.mxu3 %vm897_vm6, %v2261_v49  ;;  %v890_v32 = vpop.permute.xlu0 %889 }
 0x32e   : > { %1139 = vmatmul.msk.f32.gmra.mxu0 %vm897_vm6, %v2253_v8  ;;  %1141 = vmatmul.msk.f32.gmra.mxu2 %vm897_vm6, %v2266_v61 }
 0x32f   : > { %1143 = vmatmul.msk.f32.gmra.mxu1 %vm897_vm6, %v2253_v8  ;;  %1145 = vmatmul.msk.f32.gmra.mxu3 %vm897_vm6, %v2266_v61 }
 0x3a3   : > { %v927_v1 = vpop.f32.mrf.mxu0 }
 0x3a4   : > { %v928_v54 = vadd.f32 %v927_v1, %v880_v53  ;;  %v956_v4 = vpop.f32.mrf.mxu1 }
 0x3a5   : > { %v957_v5 = vadd.f32 %v956_v4, %v880_v53 }
 0x3a6   : > { %v979_v36 = vadd.f32 %v971_v30, %v928_v54  ;;  %v895_v54 = vpop.permute.xlu1 %894 }
 0x3a7   : > { %v980_v15 = vadd.f32 %v972_v17, %v957_v5  ;;  %v977_v17 = vld [vmem:[%s2650_s21 + $0x30] sm:$0xff] }
 0x3a8   : > { %989 = vst [vmem:[%s2654_s22] sm:$0xff] %v979_v36 }
 0x3a9   : > { %990 = vst [vmem:[%s2654_s22 + $0x8] sm:$0xff] %v980_v15  ;;  %v933_v9 = vpop.f32.mrf.mxu2  ;;  %v978_v15 = vld [vmem:[%s2650_s21 + $0x38] sm:$0xff] }
 0x3aa   : > { %v934_v62 = vadd.f32 %v933_v9, %v890_v32  ;;  %v962_v12 = vpop.f32.mrf.mxu3 }
 0x3ab   : > { %v963_v27 = vadd.f32 %v962_v12, %v890_v32  ;;  %v930_v14 = vpop.f32.mrf.mxu0 }
 0x3ac   : > { %v983_v10 = vadd.f32 %v975_v21, %v934_v62  ;;  %v931_v20 = vadd.f32 %v930_v14, %v885_v13  ;;  %v959_v22 = vpop.f32.mrf.mxu1 }
 0x3ad   : > { %v984_v24 = vadd.f32 %v976_v11, %v963_v27  ;;  %v960_v53 = vadd.f32 %v959_v22, %v885_v13 }
 0x3ae   : > { %993 = vst [vmem:[%s2654_s22 + $0x20] sm:$0xff] %v983_v10  ;;  %v981_v1 = vadd.f32 %v973_v56, %v931_v20 }
 0x3af   : > { %994 = vst [vmem:[%s2654_s22 + $0x28] sm:$0xff] %v984_v24  ;;  %v982_v30 = vadd.f32 %v974_v23, %v960_v53 }
 0x3b0   : > { %991 = vst [vmem:[%s2654_s22 + $0x10] sm:$0xff] %v981_v1 }
 0x3b1   : > { %992 = vst [vmem:[%s2654_s22 + $0x18] sm:$0xff] %v982_v30  ;;  %v936_v4 = vpop.f32.mrf.mxu2 }
 0x3b2   : > { %v937_v5 = vadd.f32 %v936_v4, %v895_v54  ;;  %v965_v36 = vpop.f32.mrf.mxu3 }
 0x3b3   : > { %v966_v32 = vadd.f32 %v965_v36, %v895_v54  ;;  %728 = sbr.rel (!%p726_p2) target bundleno = 642 (0x282), region = 105 }
 0x3b4   : > { %v985_v9 = vadd.f32 %v977_v17, %v937_v5 }
 0x3b5   : > { %v986_v21 = vadd.f32 %v978_v15, %v966_v32 }
 0x3b6   : > { %995 = vst [vmem:[%s2654_s22 + $0x30] sm:$0xff] %v985_v9 }
 0x3b7   : > { %996 = vst [vmem:[%s2654_s22 + $0x38] sm:$0xff] %v986_v21 }
 0x3b8   :  { %1009 = dma.vmem_to_hbm [thread:$0]  %s1002_s26, 2048, %s1004_s24, [#allocation4], %s1679_s27, %s1679_s27, %s1680_s28  }
 0x3b9   :  { %1565 = dma.done.wait [#allocation4], 2048  }
 0x3ba   :  { %1566 = vsyncadd [#allocation4], 4294965248 }
 0x3bb   :  { %1014 = vsyncpa [#allocation4], 1 }

</bundles_post_ra>
